<compile_context>
chip_gen: v6e
topology: v6e:2x2x1
jax: 0.10.0
libtpu: 0.0.40
codegen_flags: <defaults>
</compile_context>

<pallas_src>
import functools
import math

import jax
import jax.numpy as jnp
from jax.experimental import pallas as pl
from jax.experimental.pallas import tpu as pltpu


# ---------------------------------------------------------------------------
# Fused kernel: all LSTM layers + final Linear, grid over time chunks.
# ---------------------------------------------------------------------------
def fused_lstm_fc_kernel(x_ref, *refs, num_layers, bp, tt, Hp, unroll):
    """Refs layout (after x_ref):
         [wih_0, whh_0, b_0, ..., wih_{L-1}, whh_{L-1}, b_{L-1}, wfc, bfc,
          out_ref, h_scr, c_scr, hseq_scr, gx_scr]

    x_ref    : (Tt*Bp, Din)   bf16 flattened time-major input chunk
    wih_l    : (Din_l, 4*Hp)  bf16 W_ih^T (gate-padded)
    whh_l    : (Hp,    4*Hp)  bf16 W_hh^T (gate-padded)
    b_l      : (1,     4*Hp)  f32  b_ih + b_hh (gate-padded)
    wfc/bfc  : (Hp, C) bf16 / (1, C) f32
    out_ref  : (Bp, C) f32    written only on the last grid step
    h_scr/c_scr : (L, Bp, Hp) f32 VMEM carries, persist across grid steps
    hseq_scr : (Tt*Bp, Hp)    bf16 inter-layer hidden-state chunk
    gx_scr   : (Tt*Bp, 4*Hp)  f32 hoisted input projection for one layer/chunk
    Gate order follows PyTorch: [i, f, g, o].
    """
    n_w = 3 * num_layers
    layer_w = [refs[3 * l: 3 * l + 3] for l in range(num_layers)]
    wfc_ref = refs[n_w]
    bfc_ref = refs[n_w + 1]
    out_ref = refs[n_w + 2]
    h_scr, c_scr, hseq_scr, gx_scr = refs[n_w + 3:]

    # Zero-init the carried state on the first time chunk (torch.zeros h0/c0).
    @pl.when(pl.program_id(0) == 0)
    def _init():
        h_scr[...] = jnp.zeros_like(h_scr)
        c_scr[...] = jnp.zeros_like(c_scr)

    h_out = None
    for l, (wih_ref, whh_ref, b_ref) in enumerate(layer_w):
        last_layer = (l == num_layers - 1)

        # Layer input: original x chunk for layer 0, else the previous layer's
        # hidden-state chunk sitting in VMEM (never touches HBM).
        xin = x_ref[...] if l == 0 else hseq_scr[...]

        # Hoisted whole-chunk input projection: ONE bf16 MXU matmul per layer
        # per chunk with the bias folded in once.
        gx_scr[...] = (
            jnp.dot(xin, wih_ref[...], preferred_element_type=jnp.float32)
            + b_ref[...]
        )

        # Weight-stationary within the chunk: load W_hh once and split the
        # columns into [i,f,g] and [o] so EUP work on the c-path overlaps the
        # o-gate MXU drain.
        whh_ifg = whh_ref[:, : 3 * Hp]
        whh_o = whh_ref[:, 3 * Hp: 4 * Hp]

        h = h_scr[l]
        c = c_scr[l]

        def step(row, h, c):
            hb = h.astype(jnp.bfloat16)
            g_ifg = gx_scr[pl.ds(row, bp), : 3 * Hp] + jnp.dot(
                hb, whh_ifg, preferred_element_type=jnp.float32)
            g_o = gx_scr[pl.ds(row, bp), 3 * Hp: 4 * Hp] + jnp.dot(
                hb, whh_o, preferred_element_type=jnp.float32)
            i_g = jax.nn.sigmoid(g_ifg[:, 0 * Hp: 1 * Hp])   # lane-aligned
            f_g = jax.nn.sigmoid(g_ifg[:, 1 * Hp: 2 * Hp])
            g_g = jnp.tanh(g_ifg[:, 2 * Hp: 3 * Hp])
            c_new = f_g * c + i_g * g_g
            h_new = jax.nn.sigmoid(g_o) * jnp.tanh(c_new)
            if not last_layer:
                # gx for this layer already consumed hseq_scr, so overwriting
                # it in place with this layer's outputs is safe.
                hseq_scr[pl.ds(row, bp), :] = h_new.astype(hseq_scr.dtype)
            return h_new, c_new

        if tt <= unroll:
            # Short chunk: full static unroll, static sublane-aligned offsets.
            for i in range(tt):
                h, c = step(i * bp, h, c)
        else:
            # Long chunk: bounded unroll to cap instruction-stream / vreg
            # pressure while keeping scheduler visibility.
            def body(i, carry):
                return step(pl.multiple_of(i * bp, 8), *carry)
            h, c = jax.lax.fori_loop(0, tt, body, (h, c), unroll=unroll)

        h_scr[l] = h
        c_scr[l] = c
        h_out = h

    # Fused final Linear on the last timestep's hidden state of the top layer.
    @pl.when(pl.program_id(0) == pl.num_programs(0) - 1)
    def _fc():
        out_ref[...] = (
            jnp.dot(h_out.astype(jnp.bfloat16), wfc_ref[...],
                    preferred_element_type=jnp.float32)
            + bfc_ref[...]
        )


# ---------------------------------------------------------------------------
# pallas_call wrapper
# ---------------------------------------------------------------------------
def _vmem_limit_bytes():
    # Generation-aware scoped-VMEM limit: ~3/4 of physical VMEM
    # (~48 MiB on v7x's 64 MiB/TC, ~96 MiB on v5e/v6e's 128 MiB), capped.
    try:
        cap = int(pltpu.get_tpu_info().vmem_capacity_bytes)
    except Exception:
        cap = 64 * 1024 * 1024
    return int(min(cap * 3 // 4, 100 * 1024 * 1024))


def lstm_model_forward(x, params, *, time_chunk=None, unroll=8):
    """x: (B, T, input_dim) batch_first, like the PyTorch module."""
    B, T, Din = x.shape
    Hp = params["Hp"]
    num_layers = len(params["lstm"])
    C = params["fc_w_t"].shape[1]

    # Pad batch rows to the f32 sublane granule so per-timestep accesses are
    # unmasked full tiles (padded rows are independent junk, sliced off below).
    Bp = ((max(B, 8) + 7) // 8) * 8
    Tt = T if time_chunk is None else time_chunk
    assert T % Tt == 0, "time_chunk must divide T"

    # One XLA transpose + batch pad; activations enter the kernel as bf16.
    xt = jnp.transpose(x, (1, 0, 2))
    if Bp > B:
        xt = jnp.pad(xt, ((0, 0), (0, Bp - B), (0, 0)))
    x2d = xt.reshape(T * Bp, Din).astype(jnp.bfloat16)

    chunk_rows = Tt * Bp
    n_chunks = T // Tt

    weight_args = []
    in_specs = [pl.BlockSpec((chunk_rows, Din), lambda t: (t, 0))]
    for (wih, whh, b) in params["lstm"]:
        weight_args += [wih, whh, b]
        in_specs += [
            pl.BlockSpec(wih.shape, lambda t: (0, 0)),
            pl.BlockSpec(whh.shape, lambda t: (0, 0)),
            pl.BlockSpec(b.shape, lambda t: (0, 0)),
        ]
    weight_args += [params["fc_w_t"], params["fc_b"]]
    in_specs += [
        pl.BlockSpec(params["fc_w_t"].shape, lambda t: (0, 0)),
        pl.BlockSpec(params["fc_b"].shape, lambda t: (0, 0)),
    ]

    kernel = functools.partial(
        fused_lstm_fc_kernel,
        num_layers=num_layers, bp=Bp, tt=Tt, Hp=Hp, unroll=unroll)

    out = pl.pallas_call(
        kernel,
        out_shape=jax.ShapeDtypeStruct((Bp, C), jnp.float32),
        grid_spec=pltpu.PrefetchScalarGridSpec(
            num_scalar_prefetch=0,
            grid=(n_chunks,),
            in_specs=in_specs,
            # Resident output block (constant index), written on the last step.
            out_specs=pl.BlockSpec((Bp, C), lambda t: (0, 0)),
            scratch_shapes=[
                pltpu.VMEM((num_layers, Bp, Hp), jnp.float32),   # h carries
                pltpu.VMEM((num_layers, Bp, Hp), jnp.float32),   # c carries
                pltpu.VMEM((chunk_rows, Hp), jnp.bfloat16),      # inter-layer hseq
                pltpu.VMEM((chunk_rows, 4 * Hp), jnp.float32),   # hoisted x-proj
            ],
        ),
        compiler_params=pltpu.CompilerParams(
            dimension_semantics=("arbitrary",),   # recurrence is serial in time
            vmem_limit_bytes=_vmem_limit_bytes(),
        ),
    )(x2d, *weight_args)
    return out[:B]


# ---------------------------------------------------------------------------
# Parameter init (same shapes/ranges as nn.LSTM / nn.Linear), with per-gate
# zero padding of the hidden dim to Hp (multiple of 128) and bf16 weights.
# Zero padding is numerically exact (padded gate pre-activations are 0 =>
# padded c,h stay 0 and padded FC columns are 0).
# ---------------------------------------------------------------------------
def _pad_gate_mat(w, H, Hp, in_pad):
    """w: (4H, K) gate-stacked weight -> (in_pad, 4Hp) transposed bf16."""
    K = w.shape[1]
    w4 = jnp.pad(w.reshape(4, H, K), ((0, 0), (0, Hp - H), (0, 0)))
    w_p = w4.reshape(4 * Hp, K)
    if in_pad > K:
        w_p = jnp.pad(w_p, ((0, 0), (0, in_pad - K)))
    return jnp.transpose(w_p).astype(jnp.bfloat16)


def _pad_gate_bias(b, H, Hp):
    b4 = jnp.pad(b.reshape(4, H), ((0, 0), (0, Hp - H)))
    return b4.reshape(1, 4 * Hp).astype(jnp.float32)


def init_params(key, input_dim, hidden_dim, num_layers, num_classes, lane=128):
    Hp = ((hidden_dim + lane - 1) // lane) * lane
    params = {"lstm": [], "Hp": Hp}
    k = 1.0 / math.sqrt(hidden_dim)
    for layer in range(num_layers):
        d_in = input_dim if layer == 0 else hidden_dim
        d_in_pad = input_dim if layer == 0 else Hp
        key, k1, k2, k3, k4 = jax.random.split(key, 5)
        w_ih = jax.random.uniform(k1, (4 * hidden_dim, d_in), jnp.float32, -k, k)
        w_hh = jax.random.uniform(k2, (4 * hidden_dim, hidden_dim), jnp.float32, -k, k)
        b_ih = jax.random.uniform(k3, (4 * hidden_dim,), jnp.float32, -k, k)
        b_hh = jax.random.uniform(k4, (4 * hidden_dim,), jnp.float32, -k, k)
        params["lstm"].append((
            _pad_gate_mat(w_ih, hidden_dim, Hp, d_in_pad),   # (d_in_pad, 4Hp) bf16
            _pad_gate_mat(w_hh, hidden_dim, Hp, Hp),         # (Hp, 4Hp)      bf16
            _pad_gate_bias(b_ih + b_hh, hidden_dim, Hp),     # (1, 4Hp)       f32
        ))
    key, k5, k6 = jax.random.split(key, 3)
    fc_w = jax.random.uniform(k5, (num_classes, hidden_dim), jnp.float32, -k, k)
    fc_b = jax.random.uniform(k6, (num_classes,), jnp.float32, -k, k)
    fc_w_p = jnp.pad(fc_w, ((0, 0), (0, Hp - hidden_dim)))
    params["fc_w_t"] = jnp.transpose(fc_w_p).astype(jnp.bfloat16)   # (Hp, C)
    params["fc_b"] = fc_b.reshape(1, num_classes).astype(jnp.float32)
    return params


# ---------------------------------------------------------------------------
if __name__ == "__main__":
    batch, seq, input_dim = 2, 8, 16
    hidden_dim, num_layers, num_classes = 32, 2, 8

    key = jax.random.PRNGKey(0)
    key, xkey = jax.random.split(key)
    x = jax.random.normal(xkey, (batch, seq, input_dim), jnp.float32)

    params = init_params(key, input_dim, hidden_dim, num_layers, num_classes)

    fwd = jax.jit(lambda x: lstm_model_forward(x, params, time_chunk=4))
    out = fwd(x)
    jax.block_until_ready(out)
    assert out.shape == (batch, num_classes)
    assert bool(jnp.all(jnp.isfinite(out)))
    print("KERNEL_OK")
</pallas_src>

<mosaic_0001>
module attributes {stable_mosaic.version = 11 : i64} {
  func.func @fused_lstm_fc_kernel(%arg0: i32, %arg1: memref<32x16xbf16, #tpu.memory_space<vmem>>, %arg2: memref<16x512xbf16, #tpu.memory_space<vmem>>, %arg3: memref<128x512xbf16, #tpu.memory_space<vmem>>, %arg4: memref<1x512xf32, #tpu.memory_space<vmem>>, %arg5: memref<128x512xbf16, #tpu.memory_space<vmem>>, %arg6: memref<128x512xbf16, #tpu.memory_space<vmem>>, %arg7: memref<1x512xf32, #tpu.memory_space<vmem>>, %arg8: memref<128x8xbf16, #tpu.memory_space<vmem>>, %arg9: memref<1x8xf32, #tpu.memory_space<vmem>>, %arg10: memref<8x8xf32, #tpu.memory_space<vmem>>, %arg11: memref<2x8x128xf32, #tpu.memory_space<vmem>>, %arg12: memref<2x8x128xf32, #tpu.memory_space<vmem>>, %arg13: memref<32x128xbf16, #tpu.memory_space<vmem>>, %arg14: memref<32x512xf32, #tpu.memory_space<vmem>>) attributes {dimension_semantics = [#tpu.dimension_semantics<arbitrary>], iteration_bounds = array<i64: 2>, scalar_prefetch = 0 : i64, scratch_operands = 4 : i64, tpu.core_type = #tpu.core_type<tc>, window_params = [{transform_indices = @transform_0, window_bounds = array<i64: 32, 16>}, {pipeline_mode = #tpu.pipeline_mode<synchronous>, transform_indices = @transform_1, window_bounds = array<i64: 16, 512>}, {pipeline_mode = #tpu.pipeline_mode<synchronous>, transform_indices = @transform_2, window_bounds = array<i64: 128, 512>}, {pipeline_mode = #tpu.pipeline_mode<synchronous>, transform_indices = @transform_3, window_bounds = array<i64: 1, 512>}, {pipeline_mode = #tpu.pipeline_mode<synchronous>, transform_indices = @transform_4, window_bounds = array<i64: 128, 512>}, {pipeline_mode = #tpu.pipeline_mode<synchronous>, transform_indices = @transform_5, window_bounds = array<i64: 128, 512>}, {pipeline_mode = #tpu.pipeline_mode<synchronous>, transform_indices = @transform_6, window_bounds = array<i64: 1, 512>}, {pipeline_mode = #tpu.pipeline_mode<synchronous>, transform_indices = @transform_7, window_bounds = array<i64: 128, 8>}, {pipeline_mode = #tpu.pipeline_mode<synchronous>, transform_indices = @transform_8, window_bounds = array<i64: 1, 8>}, {pipeline_mode = #tpu.pipeline_mode<synchronous>, transform_indices = @transform_9, window_bounds = array<i64: 8, 8>}]} {
    %c0_i32 = arith.constant 0 : i32
    %0 = arith.cmpi eq, %arg0, %c0_i32 : i32
    %1 = arith.extui %0 : i1 to i32
    %c0_i32_0 = arith.constant 0 : i32
    %2 = arith.cmpi ne, %1, %c0_i32_0 : i32
    scf.if %2 {
      %cst_125 = arith.constant 0.000000e+00 : f32
      %300 = vector.broadcast %cst_125 : f32 to vector<2x8x128xf32>
      %c0_126 = arith.constant 0 : index
      %c0_127 = arith.constant 0 : index
      %c0_128 = arith.constant 0 : index
      %301 = vector.load %arg11[%c0_126, %c0_127, %c0_128] : memref<2x8x128xf32, #tpu.memory_space<vmem>>, vector<2x8x128xf32>
      tpu.vector_store %arg11[%c0_126, %c0_127, %c0_128], %300 {strides = array<i32>} : memref<2x8x128xf32, #tpu.memory_space<vmem>>, vector<2x8x128xf32>,
      %cst_129 = arith.constant 0.000000e+00 : f32
      %302 = vector.broadcast %cst_129 : f32 to vector<2x8x128xf32>
      %c0_130 = arith.constant 0 : index
      %c0_131 = arith.constant 0 : index
      %c0_132 = arith.constant 0 : index
      %303 = vector.load %arg12[%c0_130, %c0_131, %c0_132] : memref<2x8x128xf32, #tpu.memory_space<vmem>>, vector<2x8x128xf32>
      tpu.vector_store %arg12[%c0_130, %c0_131, %c0_132], %302 {strides = array<i32>} : memref<2x8x128xf32, #tpu.memory_space<vmem>>, vector<2x8x128xf32>,
    } else {
    }
    %c0 = arith.constant 0 : index
    %c0_1 = arith.constant 0 : index
    %3 = vector.load %arg1[%c0, %c0_1] : memref<32x16xbf16, #tpu.memory_space<vmem>>, vector<32x16xbf16>
    %c0_2 = arith.constant 0 : index
    %c0_3 = arith.constant 0 : index
    %4 = vector.load %arg2[%c0_2, %c0_3] : memref<16x512xbf16, #tpu.memory_space<vmem>>, vector<16x512xbf16>
    %cst = arith.constant dense<0.000000e+00> : vector<32x512xf32>
    %5 = tpu.matmul %3, %4, %cst {dimension_numbers = #tpu.dot_dimension_numbers<[1], [0], [0], [1], [0, 0, 1, 1], [], []>} : vector<32x16xbf16>, vector<16x512xbf16>, vector<32x512xf32> -> vector<32x512xf32>
    %c0_4 = arith.constant 0 : index
    %c0_5 = arith.constant 0 : index
    %6 = vector.load %arg4[%c0_4, %c0_5] : memref<1x512xf32, #tpu.memory_space<vmem>>, vector<1x512xf32>
    %7 = vector.broadcast %6 : vector<1x512xf32> to vector<32x512xf32>
    %8 = arith.addf %5, %7 : vector<32x512xf32>
    %c0_6 = arith.constant 0 : index
    %c0_7 = arith.constant 0 : index
    %9 = vector.load %arg14[%c0_6, %c0_7] : memref<32x512xf32, #tpu.memory_space<vmem>>, vector<32x512xf32>
    tpu.vector_store %arg14[%c0_6, %c0_7], %8 {strides = array<i32>} : memref<32x512xf32, #tpu.memory_space<vmem>>, vector<32x512xf32>,
    %c0_8 = arith.constant 0 : index
    %c0_9 = arith.constant 0 : index
    %10 = vector.load %arg3[%c0_8, %c0_9] : memref<128x512xbf16, #tpu.memory_space<vmem>>, vector<128x384xbf16>
    %c0_10 = arith.constant 0 : index
    %c384 = arith.constant 384 : index
    %11 = vector.load %arg3[%c0_10, %c384] : memref<128x512xbf16, #tpu.memory_space<vmem>>, vector<128x128xbf16>
    %c0_11 = arith.constant 0 : index
    %c0_12 = arith.constant 0 : index
    %c0_13 = arith.constant 0 : index
    %12 = vector.load %arg11[%c0_11, %c0_12, %c0_13] : memref<2x8x128xf32, #tpu.memory_space<vmem>>, vector<1x8x128xf32>
    %13 = vector.shape_cast %12 : vector<1x8x128xf32> to vector<8x128xf32>
    %c0_14 = arith.constant 0 : index
    %c0_15 = arith.constant 0 : index
    %c0_16 = arith.constant 0 : index
    %14 = vector.load %arg12[%c0_14, %c0_15, %c0_16] : memref<2x8x128xf32, #tpu.memory_space<vmem>>, vector<1x8x128xf32>
    %15 = vector.shape_cast %14 : vector<1x8x128xf32> to vector<8x128xf32>
    %16 = arith.truncf %13 : vector<8x128xf32> to vector<8x128xbf16>
    %c0_17 = arith.constant 0 : index
    %c0_18 = arith.constant 0 : index
    %17 = vector.load %arg14[%c0_17, %c0_18] : memref<32x512xf32, #tpu.memory_space<vmem>>, vector<8x384xf32>
    %cst_19 = arith.constant dense<0.000000e+00> : vector<8x384xf32>
    %18 = tpu.matmul %16, %10, %cst_19 {dimension_numbers = #tpu.dot_dimension_numbers<[1], [0], [0], [1], [0, 0, 1, 1], [], []>} : vector<8x128xbf16>, vector<128x384xbf16>, vector<8x384xf32> -> vector<8x384xf32>
    %19 = arith.addf %17, %18 : vector<8x384xf32>
    %c0_20 = arith.constant 0 : index
    %c384_21 = arith.constant 384 : index
    %20 = vector.load %arg14[%c0_20, %c384_21] : memref<32x512xf32, #tpu.memory_space<vmem>>, vector<8x128xf32>
    %cst_22 = arith.constant dense<0.000000e+00> : vector<8x128xf32>
    %21 = tpu.matmul %16, %11, %cst_22 {dimension_numbers = #tpu.dot_dimension_numbers<[1], [0], [0], [1], [0, 0, 1, 1], [], []>} : vector<8x128xbf16>, vector<128x128xbf16>, vector<8x128xf32> -> vector<8x128xf32>
    %22 = arith.addf %20, %21 : vector<8x128xf32>
    %23 = vector.extract_strided_slice %19 {offsets = [0, 0], sizes = [8, 128], strides = [1, 1]} : vector<8x384xf32> to vector<8x128xf32>
    %24 = arith.negf %23 : vector<8x128xf32>
    %25 = math.exp %24 : vector<8x128xf32>
    %cst_23 = arith.constant 1.000000e+00 : f32
    %26 = vector.broadcast %cst_23 : f32 to vector<8x128xf32>
    %27 = arith.addf %26, %25 : vector<8x128xf32>
    %28 = arith.divf %26, %27 : vector<8x128xf32>
    %29 = vector.extract_strided_slice %19 {offsets = [0, 128], sizes = [8, 128], strides = [1, 1]} : vector<8x384xf32> to vector<8x128xf32>
    %30 = arith.negf %29 : vector<8x128xf32>
    %31 = math.exp %30 : vector<8x128xf32>
    %cst_24 = arith.constant 1.000000e+00 : f32
    %32 = vector.broadcast %cst_24 : f32 to vector<8x128xf32>
    %33 = arith.addf %32, %31 : vector<8x128xf32>
    %34 = arith.divf %32, %33 : vector<8x128xf32>
    %35 = vector.extract_strided_slice %19 {offsets = [0, 256], sizes = [8, 128], strides = [1, 1]} : vector<8x384xf32> to vector<8x128xf32>
    %36 = math.tanh %35 : vector<8x128xf32>
    %37 = arith.mulf %34, %15 : vector<8x128xf32>
    %38 = arith.mulf %28, %36 : vector<8x128xf32>
    %39 = arith.addf %37, %38 : vector<8x128xf32>
    %40 = arith.negf %22 : vector<8x128xf32>
    %41 = math.exp %40 : vector<8x128xf32>
    %cst_25 = arith.constant 1.000000e+00 : f32
    %42 = vector.broadcast %cst_25 : f32 to vector<8x128xf32>
    %43 = arith.addf %42, %41 : vector<8x128xf32>
    %44 = arith.divf %42, %43 : vector<8x128xf32>
    %45 = math.tanh %39 : vector<8x128xf32>
    %46 = arith.mulf %44, %45 : vector<8x128xf32>
    %47 = arith.truncf %46 : vector<8x128xf32> to vector<8x128xbf16>
    %c0_26 = arith.constant 0 : index
    %c0_27 = arith.constant 0 : index
    %48 = vector.load %arg13[%c0_26, %c0_27] : memref<32x128xbf16, #tpu.memory_space<vmem>>, vector<8x128xbf16>
    tpu.vector_store %arg13[%c0_26, %c0_27], %47 {strides = array<i32>} : memref<32x128xbf16, #tpu.memory_space<vmem>>, vector<8x128xbf16>,
    %49 = arith.truncf %46 : vector<8x128xf32> to vector<8x128xbf16>
    %c8 = arith.constant 8 : index
    %c0_28 = arith.constant 0 : index
    %50 = vector.load %arg14[%c8, %c0_28] : memref<32x512xf32, #tpu.memory_space<vmem>>, vector<8x384xf32>
    %cst_29 = arith.constant dense<0.000000e+00> : vector<8x384xf32>
    %51 = tpu.matmul %49, %10, %cst_29 {dimension_numbers = #tpu.dot_dimension_numbers<[1], [0], [0], [1], [0, 0, 1, 1], [], []>} : vector<8x128xbf16>, vector<128x384xbf16>, vector<8x384xf32> -> vector<8x384xf32>
    %52 = arith.addf %50, %51 : vector<8x384xf32>
    %c8_30 = arith.constant 8 : index
    %c384_31 = arith.constant 384 : index
    %53 = vector.load %arg14[%c8_30, %c384_31] : memref<32x512xf32, #tpu.memory_space<vmem>>, vector<8x128xf32>
    %cst_32 = arith.constant dense<0.000000e+00> : vector<8x128xf32>
    %54 = tpu.matmul %49, %11, %cst_32 {dimension_numbers = #tpu.dot_dimension_numbers<[1], [0], [0], [1], [0, 0, 1, 1], [], []>} : vector<8x128xbf16>, vector<128x128xbf16>, vector<8x128xf32> -> vector<8x128xf32>
    %55 = arith.addf %53, %54 : vector<8x128xf32>
    %56 = vector.extract_strided_slice %52 {offsets = [0, 0], sizes = [8, 128], strides = [1, 1]} : vector<8x384xf32> to vector<8x128xf32>
    %57 = arith.negf %56 : vector<8x128xf32>
    %58 = math.exp %57 : vector<8x128xf32>
    %cst_33 = arith.constant 1.000000e+00 : f32
    %59 = vector.broadcast %cst_33 : f32 to vector<8x128xf32>
    %60 = arith.addf %59, %58 : vector<8x128xf32>
    %61 = arith.divf %59, %60 : vector<8x128xf32>
    %62 = vector.extract_strided_slice %52 {offsets = [0, 128], sizes = [8, 128], strides = [1, 1]} : vector<8x384xf32> to vector<8x128xf32>
    %63 = arith.negf %62 : vector<8x128xf32>
    %64 = math.exp %63 : vector<8x128xf32>
    %cst_34 = arith.constant 1.000000e+00 : f32
    %65 = vector.broadcast %cst_34 : f32 to vector<8x128xf32>
    %66 = arith.addf %65, %64 : vector<8x128xf32>
    %67 = arith.divf %65, %66 : vector<8x128xf32>
    %68 = vector.extract_strided_slice %52 {offsets = [0, 256], sizes = [8, 128], strides = [1, 1]} : vector<8x384xf32> to vector<8x128xf32>
    %69 = math.tanh %68 : vector<8x128xf32>
    %70 = arith.mulf %67, %39 : vector<8x128xf32>
    %71 = arith.mulf %61, %69 : vector<8x128xf32>
    %72 = arith.addf %70, %71 : vector<8x128xf32>
    %73 = arith.negf %55 : vector<8x128xf32>
    %74 = math.exp %73 : vector<8x128xf32>
    %cst_35 = arith.constant 1.000000e+00 : f32
    %75 = vector.broadcast %cst_35 : f32 to vector<8x128xf32>
    %76 = arith.addf %75, %74 : vector<8x128xf32>
    %77 = arith.divf %75, %76 : vector<8x128xf32>
    %78 = math.tanh %72 : vector<8x128xf32>
    %79 = arith.mulf %77, %78 : vector<8x128xf32>
    %80 = arith.truncf %79 : vector<8x128xf32> to vector<8x128xbf16>
    %c8_36 = arith.constant 8 : index
    %c0_37 = arith.constant 0 : index
    %81 = vector.load %arg13[%c8_36, %c0_37] : memref<32x128xbf16, #tpu.memory_space<vmem>>, vector<8x128xbf16>
    tpu.vector_store %arg13[%c8_36, %c0_37], %80 {strides = array<i32>} : memref<32x128xbf16, #tpu.memory_space<vmem>>, vector<8x128xbf16>,
    %82 = arith.truncf %79 : vector<8x128xf32> to vector<8x128xbf16>
    %c16 = arith.constant 16 : index
    %c0_38 = arith.constant 0 : index
    %83 = vector.load %arg14[%c16, %c0_38] : memref<32x512xf32, #tpu.memory_space<vmem>>, vector<8x384xf32>
    %cst_39 = arith.constant dense<0.000000e+00> : vector<8x384xf32>
    %84 = tpu.matmul %82, %10, %cst_39 {dimension_numbers = #tpu.dot_dimension_numbers<[1], [0], [0], [1], [0, 0, 1, 1], [], []>} : vector<8x128xbf16>, vector<128x384xbf16>, vector<8x384xf32> -> vector<8x384xf32>
    %85 = arith.addf %83, %84 : vector<8x384xf32>
    %c16_40 = arith.constant 16 : index
    %c384_41 = arith.constant 384 : index
    %86 = vector.load %arg14[%c16_40, %c384_41] : memref<32x512xf32, #tpu.memory_space<vmem>>, vector<8x128xf32>
    %cst_42 = arith.constant dense<0.000000e+00> : vector<8x128xf32>
    %87 = tpu.matmul %82, %11, %cst_42 {dimension_numbers = #tpu.dot_dimension_numbers<[1], [0], [0], [1], [0, 0, 1, 1], [], []>} : vector<8x128xbf16>, vector<128x128xbf16>, vector<8x128xf32> -> vector<8x128xf32>
    %88 = arith.addf %86, %87 : vector<8x128xf32>
    %89 = vector.extract_strided_slice %85 {offsets = [0, 0], sizes = [8, 128], strides = [1, 1]} : vector<8x384xf32> to vector<8x128xf32>
    %90 = arith.negf %89 : vector<8x128xf32>
    %91 = math.exp %90 : vector<8x128xf32>
    %cst_43 = arith.constant 1.000000e+00 : f32
    %92 = vector.broadcast %cst_43 : f32 to vector<8x128xf32>
    %93 = arith.addf %92, %91 : vector<8x128xf32>
    %94 = arith.divf %92, %93 : vector<8x128xf32>
    %95 = vector.extract_strided_slice %85 {offsets = [0, 128], sizes = [8, 128], strides = [1, 1]} : vector<8x384xf32> to vector<8x128xf32>
    %96 = arith.negf %95 : vector<8x128xf32>
    %97 = math.exp %96 : vector<8x128xf32>
    %cst_44 = arith.constant 1.000000e+00 : f32
    %98 = vector.broadcast %cst_44 : f32 to vector<8x128xf32>
    %99 = arith.addf %98, %97 : vector<8x128xf32>
    %100 = arith.divf %98, %99 : vector<8x128xf32>
    %101 = vector.extract_strided_slice %85 {offsets = [0, 256], sizes = [8, 128], strides = [1, 1]} : vector<8x384xf32> to vector<8x128xf32>
    %102 = math.tanh %101 : vector<8x128xf32>
    %103 = arith.mulf %100, %72 : vector<8x128xf32>
    %104 = arith.mulf %94, %102 : vector<8x128xf32>
    %105 = arith.addf %103, %104 : vector<8x128xf32>
    %106 = arith.negf %88 : vector<8x128xf32>
    %107 = math.exp %106 : vector<8x128xf32>
    %cst_45 = arith.constant 1.000000e+00 : f32
    %108 = vector.broadcast %cst_45 : f32 to vector<8x128xf32>
    %109 = arith.addf %108, %107 : vector<8x128xf32>
    %110 = arith.divf %108, %109 : vector<8x128xf32>
    %111 = math.tanh %105 : vector<8x128xf32>
    %112 = arith.mulf %110, %111 : vector<8x128xf32>
    %113 = arith.truncf %112 : vector<8x128xf32> to vector<8x128xbf16>
    %c16_46 = arith.constant 16 : index
    %c0_47 = arith.constant 0 : index
    %114 = vector.load %arg13[%c16_46, %c0_47] : memref<32x128xbf16, #tpu.memory_space<vmem>>, vector<8x128xbf16>
    tpu.vector_store %arg13[%c16_46, %c0_47], %113 {strides = array<i32>} : memref<32x128xbf16, #tpu.memory_space<vmem>>, vector<8x128xbf16>,
    %115 = arith.truncf %112 : vector<8x128xf32> to vector<8x128xbf16>
    %c24 = arith.constant 24 : index
    %c0_48 = arith.constant 0 : index
    %116 = vector.load %arg14[%c24, %c0_48] : memref<32x512xf32, #tpu.memory_space<vmem>>, vector<8x384xf32>
    %cst_49 = arith.constant dense<0.000000e+00> : vector<8x384xf32>
    %117 = tpu.matmul %115, %10, %cst_49 {dimension_numbers = #tpu.dot_dimension_numbers<[1], [0], [0], [1], [0, 0, 1, 1], [], []>} : vector<8x128xbf16>, vector<128x384xbf16>, vector<8x384xf32> -> vector<8x384xf32>
    %118 = arith.addf %116, %117 : vector<8x384xf32>
    %c24_50 = arith.constant 24 : index
    %c384_51 = arith.constant 384 : index
    %119 = vector.load %arg14[%c24_50, %c384_51] : memref<32x512xf32, #tpu.memory_space<vmem>>, vector<8x128xf32>
    %cst_52 = arith.constant dense<0.000000e+00> : vector<8x128xf32>
    %120 = tpu.matmul %115, %11, %cst_52 {dimension_numbers = #tpu.dot_dimension_numbers<[1], [0], [0], [1], [0, 0, 1, 1], [], []>} : vector<8x128xbf16>, vector<128x128xbf16>, vector<8x128xf32> -> vector<8x128xf32>
    %121 = arith.addf %119, %120 : vector<8x128xf32>
    %122 = vector.extract_strided_slice %118 {offsets = [0, 0], sizes = [8, 128], strides = [1, 1]} : vector<8x384xf32> to vector<8x128xf32>
    %123 = arith.negf %122 : vector<8x128xf32>
    %124 = math.exp %123 : vector<8x128xf32>
    %cst_53 = arith.constant 1.000000e+00 : f32
    %125 = vector.broadcast %cst_53 : f32 to vector<8x128xf32>
    %126 = arith.addf %125, %124 : vector<8x128xf32>
    %127 = arith.divf %125, %126 : vector<8x128xf32>
    %128 = vector.extract_strided_slice %118 {offsets = [0, 128], sizes = [8, 128], strides = [1, 1]} : vector<8x384xf32> to vector<8x128xf32>
    %129 = arith.negf %128 : vector<8x128xf32>
    %130 = math.exp %129 : vector<8x128xf32>
    %cst_54 = arith.constant 1.000000e+00 : f32
    %131 = vector.broadcast %cst_54 : f32 to vector<8x128xf32>
    %132 = arith.addf %131, %130 : vector<8x128xf32>
    %133 = arith.divf %131, %132 : vector<8x128xf32>
    %134 = vector.extract_strided_slice %118 {offsets = [0, 256], sizes = [8, 128], strides = [1, 1]} : vector<8x384xf32> to vector<8x128xf32>
    %135 = math.tanh %134 : vector<8x128xf32>
    %136 = arith.mulf %133, %105 : vector<8x128xf32>
    %137 = arith.mulf %127, %135 : vector<8x128xf32>
    %138 = arith.addf %136, %137 : vector<8x128xf32>
    %139 = arith.negf %121 : vector<8x128xf32>
    %140 = math.exp %139 : vector<8x128xf32>
    %cst_55 = arith.constant 1.000000e+00 : f32
    %141 = vector.broadcast %cst_55 : f32 to vector<8x128xf32>
    %142 = arith.addf %141, %140 : vector<8x128xf32>
    %143 = arith.divf %141, %142 : vector<8x128xf32>
    %144 = math.tanh %138 : vector<8x128xf32>
    %145 = arith.mulf %143, %144 : vector<8x128xf32>
    %146 = arith.truncf %145 : vector<8x128xf32> to vector<8x128xbf16>
    %c24_56 = arith.constant 24 : index
    %c0_57 = arith.constant 0 : index
    %147 = vector.load %arg13[%c24_56, %c0_57] : memref<32x128xbf16, #tpu.memory_space<vmem>>, vector<8x128xbf16>
    tpu.vector_store %arg13[%c24_56, %c0_57], %146 {strides = array<i32>} : memref<32x128xbf16, #tpu.memory_space<vmem>>, vector<8x128xbf16>,
    %c0_58 = arith.constant 0 : index
    %c0_59 = arith.constant 0 : index
    %c0_60 = arith.constant 0 : index
    %148 = vector.load %arg11[%c0_58, %c0_59, %c0_60] : memref<2x8x128xf32, #tpu.memory_space<vmem>>, vector<1x8x128xf32>
    %149 = vector.shape_cast %148 : vector<1x8x128xf32> to vector<8x128xf32>
    %150 = vector.shape_cast %145 : vector<8x128xf32> to vector<1x8x128xf32>
    tpu.vector_store %arg11[%c0_58, %c0_59, %c0_60], %150 {strides = array<i32>} : memref<2x8x128xf32, #tpu.memory_space<vmem>>, vector<1x8x128xf32>,
    %c0_61 = arith.constant 0 : index
    %c0_62 = arith.constant 0 : index
    %c0_63 = arith.constant 0 : index
    %151 = vector.load %arg12[%c0_61, %c0_62, %c0_63] : memref<2x8x128xf32, #tpu.memory_space<vmem>>, vector<1x8x128xf32>
    %152 = vector.shape_cast %151 : vector<1x8x128xf32> to vector<8x128xf32>
    %153 = vector.shape_cast %138 : vector<8x128xf32> to vector<1x8x128xf32>
    tpu.vector_store %arg12[%c0_61, %c0_62, %c0_63], %153 {strides = array<i32>} : memref<2x8x128xf32, #tpu.memory_space<vmem>>, vector<1x8x128xf32>,
    %c0_64 = arith.constant 0 : index
    %c0_65 = arith.constant 0 : index
    %154 = vector.load %arg13[%c0_64, %c0_65] : memref<32x128xbf16, #tpu.memory_space<vmem>>, vector<32x128xbf16>
    %c0_66 = arith.constant 0 : index
    %c0_67 = arith.constant 0 : index
    %155 = vector.load %arg5[%c0_66, %c0_67] : memref<128x512xbf16, #tpu.memory_space<vmem>>, vector<128x512xbf16>
    %cst_68 = arith.constant dense<0.000000e+00> : vector<32x512xf32>
    %156 = tpu.matmul %154, %155, %cst_68 {dimension_numbers = #tpu.dot_dimension_numbers<[1], [0], [0], [1], [0, 0, 1, 1], [], []>} : vector<32x128xbf16>, vector<128x512xbf16>, vector<32x512xf32> -> vector<32x512xf32>
    %c0_69 = arith.constant 0 : index
    %c0_70 = arith.constant 0 : index
    %157 = vector.load %arg7[%c0_69, %c0_70] : memref<1x512xf32, #tpu.memory_space<vmem>>, vector<1x512xf32>
    %158 = vector.broadcast %157 : vector<1x512xf32> to vector<32x512xf32>
    %159 = arith.addf %156, %158 : vector<32x512xf32>
    %c0_71 = arith.constant 0 : index
    %c0_72 = arith.constant 0 : index
    %160 = vector.load %arg14[%c0_71, %c0_72] : memref<32x512xf32, #tpu.memory_space<vmem>>, vector<32x512xf32>
    tpu.vector_store %arg14[%c0_71, %c0_72], %159 {strides = array<i32>} : memref<32x512xf32, #tpu.memory_space<vmem>>, vector<32x512xf32>,
    %c0_73 = arith.constant 0 : index
    %c0_74 = arith.constant 0 : index
    %161 = vector.load %arg6[%c0_73, %c0_74] : memref<128x512xbf16, #tpu.memory_space<vmem>>, vector<128x384xbf16>
    %c0_75 = arith.constant 0 : index
    %c384_76 = arith.constant 384 : index
    %162 = vector.load %arg6[%c0_75, %c384_76] : memref<128x512xbf16, #tpu.memory_space<vmem>>, vector<128x128xbf16>
    %c1 = arith.constant 1 : index
    %c0_77 = arith.constant 0 : index
    %c0_78 = arith.constant 0 : index
    %163 = vector.load %arg11[%c1, %c0_77, %c0_78] : memref<2x8x128xf32, #tpu.memory_space<vmem>>, vector<1x8x128xf32>
    %164 = vector.shape_cast %163 : vector<1x8x128xf32> to vector<8x128xf32>
    %c1_79 = arith.constant 1 : index
    %c0_80 = arith.constant 0 : index
    %c0_81 = arith.constant 0 : index
    %165 = vector.load %arg12[%c1_79, %c0_80, %c0_81] : memref<2x8x128xf32, #tpu.memory_space<vmem>>, vector<1x8x128xf32>
    %166 = vector.shape_cast %165 : vector<1x8x128xf32> to vector<8x128xf32>
    %167 = arith.truncf %164 : vector<8x128xf32> to vector<8x128xbf16>
    %c0_82 = arith.constant 0 : index
    %c0_83 = arith.constant 0 : index
    %168 = vector.load %arg14[%c0_82, %c0_83] : memref<32x512xf32, #tpu.memory_space<vmem>>, vector<8x384xf32>
    %cst_84 = arith.constant dense<0.000000e+00> : vector<8x384xf32>
    %169 = tpu.matmul %167, %161, %cst_84 {dimension_numbers = #tpu.dot_dimension_numbers<[1], [0], [0], [1], [0, 0, 1, 1], [], []>} : vector<8x128xbf16>, vector<128x384xbf16>, vector<8x384xf32> -> vector<8x384xf32>
    %170 = arith.addf %168, %169 : vector<8x384xf32>
    %c0_85 = arith.constant 0 : index
    %c384_86 = arith.constant 384 : index
    %171 = vector.load %arg14[%c0_85, %c384_86] : memref<32x512xf32, #tpu.memory_space<vmem>>, vector<8x128xf32>
    %cst_87 = arith.constant dense<0.000000e+00> : vector<8x128xf32>
    %172 = tpu.matmul %167, %162, %cst_87 {dimension_numbers = #tpu.dot_dimension_numbers<[1], [0], [0], [1], [0, 0, 1, 1], [], []>} : vector<8x128xbf16>, vector<128x128xbf16>, vector<8x128xf32> -> vector<8x128xf32>
    %173 = arith.addf %171, %172 : vector<8x128xf32>
    %174 = vector.extract_strided_slice %170 {offsets = [0, 0], sizes = [8, 128], strides = [1, 1]} : vector<8x384xf32> to vector<8x128xf32>
    %175 = arith.negf %174 : vector<8x128xf32>
    %176 = math.exp %175 : vector<8x128xf32>
    %cst_88 = arith.constant 1.000000e+00 : f32
    %177 = vector.broadcast %cst_88 : f32 to vector<8x128xf32>
    %178 = arith.addf %177, %176 : vector<8x128xf32>
    %179 = arith.divf %177, %178 : vector<8x128xf32>
    %180 = vector.extract_strided_slice %170 {offsets = [0, 128], sizes = [8, 128], strides = [1, 1]} : vector<8x384xf32> to vector<8x128xf32>
    %181 = arith.negf %180 : vector<8x128xf32>
    %182 = math.exp %181 : vector<8x128xf32>
    %cst_89 = arith.constant 1.000000e+00 : f32
    %183 = vector.broadcast %cst_89 : f32 to vector<8x128xf32>
    %184 = arith.addf %183, %182 : vector<8x128xf32>
    %185 = arith.divf %183, %184 : vector<8x128xf32>
    %186 = vector.extract_strided_slice %170 {offsets = [0, 256], sizes = [8, 128], strides = [1, 1]} : vector<8x384xf32> to vector<8x128xf32>
    %187 = math.tanh %186 : vector<8x128xf32>
    %188 = arith.mulf %185, %166 : vector<8x128xf32>
    %189 = arith.mulf %179, %187 : vector<8x128xf32>
    %190 = arith.addf %188, %189 : vector<8x128xf32>
    %191 = arith.negf %173 : vector<8x128xf32>
    %192 = math.exp %191 : vector<8x128xf32>
    %cst_90 = arith.constant 1.000000e+00 : f32
    %193 = vector.broadcast %cst_90 : f32 to vector<8x128xf32>
    %194 = arith.addf %193, %192 : vector<8x128xf32>
    %195 = arith.divf %193, %194 : vector<8x128xf32>
    %196 = math.tanh %190 : vector<8x128xf32>
    %197 = arith.mulf %195, %196 : vector<8x128xf32>
    %198 = arith.truncf %197 : vector<8x128xf32> to vector<8x128xbf16>
    %c8_91 = arith.constant 8 : index
    %c0_92 = arith.constant 0 : index
    %199 = vector.load %arg14[%c8_91, %c0_92] : memref<32x512xf32, #tpu.memory_space<vmem>>, vector<8x384xf32>
    %cst_93 = arith.constant dense<0.000000e+00> : vector<8x384xf32>
    %200 = tpu.matmul %198, %161, %cst_93 {dimension_numbers = #tpu.dot_dimension_numbers<[1], [0], [0], [1], [0, 0, 1, 1], [], []>} : vector<8x128xbf16>, vector<128x384xbf16>, vector<8x384xf32> -> vector<8x384xf32>
    %201 = arith.addf %199, %200 : vector<8x384xf32>
    %c8_94 = arith.constant 8 : index
    %c384_95 = arith.constant 384 : index
    %202 = vector.load %arg14[%c8_94, %c384_95] : memref<32x512xf32, #tpu.memory_space<vmem>>, vector<8x128xf32>
    %cst_96 = arith.constant dense<0.000000e+00> : vector<8x128xf32>
    %203 = tpu.matmul %198, %162, %cst_96 {dimension_numbers = #tpu.dot_dimension_numbers<[1], [0], [0], [1], [0, 0, 1, 1], [], []>} : vector<8x128xbf16>, vector<128x128xbf16>, vector<8x128xf32> -> vector<8x128xf32>
    %204 = arith.addf %202, %203 : vector<8x128xf32>
    %205 = vector.extract_strided_slice %201 {offsets = [0, 0], sizes = [8, 128], strides = [1, 1]} : vector<8x384xf32> to vector<8x128xf32>
    %206 = arith.negf %205 : vector<8x128xf32>
    %207 = math.exp %206 : vector<8x128xf32>
    %cst_97 = arith.constant 1.000000e+00 : f32
    %208 = vector.broadcast %cst_97 : f32 to vector<8x128xf32>
    %209 = arith.addf %208, %207 : vector<8x128xf32>
    %210 = arith.divf %208, %209 : vector<8x128xf32>
    %211 = vector.extract_strided_slice %201 {offsets = [0, 128], sizes = [8, 128], strides = [1, 1]} : vector<8x384xf32> to vector<8x128xf32>
    %212 = arith.negf %211 : vector<8x128xf32>
    %213 = math.exp %212 : vector<8x128xf32>
    %cst_98 = arith.constant 1.000000e+00 : f32
    %214 = vector.broadcast %cst_98 : f32 to vector<8x128xf32>
    %215 = arith.addf %214, %213 : vector<8x128xf32>
    %216 = arith.divf %214, %215 : vector<8x128xf32>
    %217 = vector.extract_strided_slice %201 {offsets = [0, 256], sizes = [8, 128], strides = [1, 1]} : vector<8x384xf32> to vector<8x128xf32>
    %218 = math.tanh %217 : vector<8x128xf32>
    %219 = arith.mulf %216, %190 : vector<8x128xf32>
    %220 = arith.mulf %210, %218 : vector<8x128xf32>
    %221 = arith.addf %219, %220 : vector<8x128xf32>
    %222 = arith.negf %204 : vector<8x128xf32>
    %223 = math.exp %222 : vector<8x128xf32>
    %cst_99 = arith.constant 1.000000e+00 : f32
    %224 = vector.broadcast %cst_99 : f32 to vector<8x128xf32>
    %225 = arith.addf %224, %223 : vector<8x128xf32>
    %226 = arith.divf %224, %225 : vector<8x128xf32>
    %227 = math.tanh %221 : vector<8x128xf32>
    %228 = arith.mulf %226, %227 : vector<8x128xf32>
    %229 = arith.truncf %228 : vector<8x128xf32> to vector<8x128xbf16>
    %c16_100 = arith.constant 16 : index
    %c0_101 = arith.constant 0 : index
    %230 = vector.load %arg14[%c16_100, %c0_101] : memref<32x512xf32, #tpu.memory_space<vmem>>, vector<8x384xf32>
    %cst_102 = arith.constant dense<0.000000e+00> : vector<8x384xf32>
    %231 = tpu.matmul %229, %161, %cst_102 {dimension_numbers = #tpu.dot_dimension_numbers<[1], [0], [0], [1], [0, 0, 1, 1], [], []>} : vector<8x128xbf16>, vector<128x384xbf16>, vector<8x384xf32> -> vector<8x384xf32>
    %232 = arith.addf %230, %231 : vector<8x384xf32>
    %c16_103 = arith.constant 16 : index
    %c384_104 = arith.constant 384 : index
    %233 = vector.load %arg14[%c16_103, %c384_104] : memref<32x512xf32, #tpu.memory_space<vmem>>, vector<8x128xf32>
    %cst_105 = arith.constant dense<0.000000e+00> : vector<8x128xf32>
    %234 = tpu.matmul %229, %162, %cst_105 {dimension_numbers = #tpu.dot_dimension_numbers<[1], [0], [0], [1], [0, 0, 1, 1], [], []>} : vector<8x128xbf16>, vector<128x128xbf16>, vector<8x128xf32> -> vector<8x128xf32>
    %235 = arith.addf %233, %234 : vector<8x128xf32>
    %236 = vector.extract_strided_slice %232 {offsets = [0, 0], sizes = [8, 128], strides = [1, 1]} : vector<8x384xf32> to vector<8x128xf32>
    %237 = arith.negf %236 : vector<8x128xf32>
    %238 = math.exp %237 : vector<8x128xf32>
    %cst_106 = arith.constant 1.000000e+00 : f32
    %239 = vector.broadcast %cst_106 : f32 to vector<8x128xf32>
    %240 = arith.addf %239, %238 : vector<8x128xf32>
    %241 = arith.divf %239, %240 : vector<8x128xf32>
    %242 = vector.extract_strided_slice %232 {offsets = [0, 128], sizes = [8, 128], strides = [1, 1]} : vector<8x384xf32> to vector<8x128xf32>
    %243 = arith.negf %242 : vector<8x128xf32>
    %244 = math.exp %243 : vector<8x128xf32>
    %cst_107 = arith.constant 1.000000e+00 : f32
    %245 = vector.broadcast %cst_107 : f32 to vector<8x128xf32>
    %246 = arith.addf %245, %244 : vector<8x128xf32>
    %247 = arith.divf %245, %246 : vector<8x128xf32>
    %248 = vector.extract_strided_slice %232 {offsets = [0, 256], sizes = [8, 128], strides = [1, 1]} : vector<8x384xf32> to vector<8x128xf32>
    %249 = math.tanh %248 : vector<8x128xf32>
    %250 = arith.mulf %247, %221 : vector<8x128xf32>
    %251 = arith.mulf %241, %249 : vector<8x128xf32>
    %252 = arith.addf %250, %251 : vector<8x128xf32>
    %253 = arith.negf %235 : vector<8x128xf32>
    %254 = math.exp %253 : vector<8x128xf32>
    %cst_108 = arith.constant 1.000000e+00 : f32
    %255 = vector.broadcast %cst_108 : f32 to vector<8x128xf32>
    %256 = arith.addf %255, %254 : vector<8x128xf32>
    %257 = arith.divf %255, %256 : vector<8x128xf32>
    %258 = math.tanh %252 : vector<8x128xf32>
    %259 = arith.mulf %257, %258 : vector<8x128xf32>
    %260 = arith.truncf %259 : vector<8x128xf32> to vector<8x128xbf16>
    %c24_109 = arith.constant 24 : index
    %c0_110 = arith.constant 0 : index
    %261 = vector.load %arg14[%c24_109, %c0_110] : memref<32x512xf32, #tpu.memory_space<vmem>>, vector<8x384xf32>
    %cst_111 = arith.constant dense<0.000000e+00> : vector<8x384xf32>
    %262 = tpu.matmul %260, %161, %cst_111 {dimension_numbers = #tpu.dot_dimension_numbers<[1], [0], [0], [1], [0, 0, 1, 1], [], []>} : vector<8x128xbf16>, vector<128x384xbf16>, vector<8x384xf32> -> vector<8x384xf32>
    %263 = arith.addf %261, %262 : vector<8x384xf32>
    %c24_112 = arith.constant 24 : index
    %c384_113 = arith.constant 384 : index
    %264 = vector.load %arg14[%c24_112, %c384_113] : memref<32x512xf32, #tpu.memory_space<vmem>>, vector<8x128xf32>
    %cst_114 = arith.constant dense<0.000000e+00> : vector<8x128xf32>
    %265 = tpu.matmul %260, %162, %cst_114 {dimension_numbers = #tpu.dot_dimension_numbers<[1], [0], [0], [1], [0, 0, 1, 1], [], []>} : vector<8x128xbf16>, vector<128x128xbf16>, vector<8x128xf32> -> vector<8x128xf32>
    %266 = arith.addf %264, %265 : vector<8x128xf32>
    %267 = vector.extract_strided_slice %263 {offsets = [0, 0], sizes = [8, 128], strides = [1, 1]} : vector<8x384xf32> to vector<8x128xf32>
    %268 = arith.negf %267 : vector<8x128xf32>
    %269 = math.exp %268 : vector<8x128xf32>
    %cst_115 = arith.constant 1.000000e+00 : f32
    %270 = vector.broadcast %cst_115 : f32 to vector<8x128xf32>
    %271 = arith.addf %270, %269 : vector<8x128xf32>
    %272 = arith.divf %270, %271 : vector<8x128xf32>
    %273 = vector.extract_strided_slice %263 {offsets = [0, 128], sizes = [8, 128], strides = [1, 1]} : vector<8x384xf32> to vector<8x128xf32>
    %274 = arith.negf %273 : vector<8x128xf32>
    %275 = math.exp %274 : vector<8x128xf32>
    %cst_116 = arith.constant 1.000000e+00 : f32
    %276 = vector.broadcast %cst_116 : f32 to vector<8x128xf32>
    %277 = arith.addf %276, %275 : vector<8x128xf32>
    %278 = arith.divf %276, %277 : vector<8x128xf32>
    %279 = vector.extract_strided_slice %263 {offsets = [0, 256], sizes = [8, 128], strides = [1, 1]} : vector<8x384xf32> to vector<8x128xf32>
    %280 = math.tanh %279 : vector<8x128xf32>
    %281 = arith.mulf %278, %252 : vector<8x128xf32>
    %282 = arith.mulf %272, %280 : vector<8x128xf32>
    %283 = arith.addf %281, %282 : vector<8x128xf32>
    %284 = arith.negf %266 : vector<8x128xf32>
    %285 = math.exp %284 : vector<8x128xf32>
    %cst_117 = arith.constant 1.000000e+00 : f32
    %286 = vector.broadcast %cst_117 : f32 to vector<8x128xf32>
    %287 = arith.addf %286, %285 : vector<8x128xf32>
    %288 = arith.divf %286, %287 : vector<8x128xf32>
    %289 = math.tanh %283 : vector<8x128xf32>
    %290 = arith.mulf %288, %289 : vector<8x128xf32>
    %c1_118 = arith.constant 1 : index
    %c0_119 = arith.constant 0 : index
    %c0_120 = arith.constant 0 : index
    %291 = vector.load %arg11[%c1_118, %c0_119, %c0_120] : memref<2x8x128xf32, #tpu.memory_space<vmem>>, vector<1x8x128xf32>
    %292 = vector.shape_cast %291 : vector<1x8x128xf32> to vector<8x128xf32>
    %293 = vector.shape_cast %290 : vector<8x128xf32> to vector<1x8x128xf32>
    tpu.vector_store %arg11[%c1_118, %c0_119, %c0_120], %293 {strides = array<i32>} : memref<2x8x128xf32, #tpu.memory_space<vmem>>, vector<1x8x128xf32>,
    %c1_121 = arith.constant 1 : index
    %c0_122 = arith.constant 0 : index
    %c0_123 = arith.constant 0 : index
    %294 = vector.load %arg12[%c1_121, %c0_122, %c0_123] : memref<2x8x128xf32, #tpu.memory_space<vmem>>, vector<1x8x128xf32>
    %295 = vector.shape_cast %294 : vector<1x8x128xf32> to vector<8x128xf32>
    %296 = vector.shape_cast %283 : vector<8x128xf32> to vector<1x8x128xf32>
    tpu.vector_store %arg12[%c1_121, %c0_122, %c0_123], %296 {strides = array<i32>} : memref<2x8x128xf32, #tpu.memory_space<vmem>>, vector<1x8x128xf32>,
    %c1_i32 = arith.constant 1 : i32
    %297 = arith.cmpi eq, %arg0, %c1_i32 : i32
    %298 = arith.extui %297 : i1 to i32
    %c0_i32_124 = arith.constant 0 : i32
    %299 = arith.cmpi ne, %298, %c0_i32_124 : i32
    scf.if %299 {
      %300 = arith.truncf %290 : vector<8x128xf32> to vector<8x128xbf16>
      %c0_125 = arith.constant 0 : index
      %c0_126 = arith.constant 0 : index
      %301 = vector.load %arg8[%c0_125, %c0_126] : memref<128x8xbf16, #tpu.memory_space<vmem>>, vector<128x8xbf16>
      %cst_127 = arith.constant dense<0.000000e+00> : vector<8x8xf32>
      %302 = tpu.matmul %300, %301, %cst_127 {dimension_numbers = #tpu.dot_dimension_numbers<[1], [0], [0], [1], [0, 0, 1, 1], [], []>} : vector<8x128xbf16>, vector<128x8xbf16>, vector<8x8xf32> -> vector<8x8xf32>
      %c0_128 = arith.constant 0 : index
      %c0_129 = arith.constant 0 : index
      %303 = vector.load %arg9[%c0_128, %c0_129] : memref<1x8xf32, #tpu.memory_space<vmem>>, vector<1x8xf32>
      %304 = vector.broadcast %303 : vector<1x8xf32> to vector<8x8xf32>
      %305 = arith.addf %302, %304 : vector<8x8xf32>
      %c0_130 = arith.constant 0 : index
      %c0_131 = arith.constant 0 : index
      %306 = vector.load %arg10[%c0_130, %c0_131] : memref<8x8xf32, #tpu.memory_space<vmem>>, vector<8x8xf32>
      tpu.vector_store %arg10[%c0_130, %c0_131], %305 {strides = array<i32>} : memref<8x8xf32, #tpu.memory_space<vmem>>, vector<8x8xf32>,
    } else {
    }
    return
  }
  func.func @transform_0(%arg0: i32) -> (i32, i32) {
    %c0_i32 = arith.constant 0 : i32
    %c0_i32_0 = arith.constant 0 : i32
    return %arg0, %c0_i32 : i32, i32
  }
  func.func @transform_1(%arg0: i32) -> (i32, i32) {
    %c0_i32 = arith.constant 0 : i32
    %c0_i32_0 = arith.constant 0 : i32
    %c0_i32_1 = arith.constant 0 : i32
    return %c0_i32, %c0_i32_0 : i32, i32
  }
  func.func @transform_2(%arg0: i32) -> (i32, i32) {
    %c0_i32 = arith.constant 0 : i32
    %c0_i32_0 = arith.constant 0 : i32
    %c0_i32_1 = arith.constant 0 : i32
    return %c0_i32, %c0_i32_0 : i32, i32
  }
  func.func @transform_3(%arg0: i32) -> (i32, i32) {
    %c0_i32 = arith.constant 0 : i32
    %c0_i32_0 = arith.constant 0 : i32
    %c0_i32_1 = arith.constant 0 : i32
    return %c0_i32, %c0_i32_0 : i32, i32
  }
  func.func @transform_4(%arg0: i32) -> (i32, i32) {
    %c0_i32 = arith.constant 0 : i32
    %c0_i32_0 = arith.constant 0 : i32
    %c0_i32_1 = arith.constant 0 : i32
    return %c0_i32, %c0_i32_0 : i32, i32
  }
  func.func @transform_5(%arg0: i32) -> (i32, i32) {
    %c0_i32 = arith.constant 0 : i32
    %c0_i32_0 = arith.constant 0 : i32
    %c0_i32_1 = arith.constant 0 : i32
    return %c0_i32, %c0_i32_0 : i32, i32
  }
  func.func @transform_6(%arg0: i32) -> (i32, i32) {
    %c0_i32 = arith.constant 0 : i32
    %c0_i32_0 = arith.constant 0 : i32
    %c0_i32_1 = arith.constant 0 : i32
    return %c0_i32, %c0_i32_0 : i32, i32
  }
  func.func @transform_7(%arg0: i32) -> (i32, i32) {
    %c0_i32 = arith.constant 0 : i32
    %c0_i32_0 = arith.constant 0 : i32
    %c0_i32_1 = arith.constant 0 : i32
    return %c0_i32, %c0_i32_0 : i32, i32
  }
  func.func @transform_8(%arg0: i32) -> (i32, i32) {
    %c0_i32 = arith.constant 0 : i32
    %c0_i32_0 = arith.constant 0 : i32
    %c0_i32_1 = arith.constant 0 : i32
    return %c0_i32, %c0_i32_0 : i32, i32
  }
  func.func @transform_9(%arg0: i32) -> (i32, i32) {
    %c0_i32 = arith.constant 0 : i32
    %c0_i32_0 = arith.constant 0 : i32
    %c0_i32_1 = arith.constant 0 : i32
    return %c0_i32, %c0_i32_0 : i32, i32
  }
}

</mosaic_0001>

<bundles_post_ra>
// kernel: _lambda_.1
= control target key start
LH: loop header
LB: loop body
LE: loop exit
PB: predicated region body
PF: predicated region fallthrough
CT: control target
= control target key end

     0   :  { %14 = vsyncpa [#allocation7], 0  ;;  %s4837_s0 = inlined_call_operand.vmem [shape: bf16[64,16], index: 0, kind: input, shape index: {}]   ;;  %s4838_s1 = inlined_call_operand.hbm [shape: bf16[16,512], index: 1, kind: input, shape index: {}]   ;;  %s4839_s2 = inlined_call_operand.hbm [shape: bf16[128,512], index: 2, kind: input, shape index: {}]   ;;  %s4840_s3 = inlined_call_operand.vmem [shape: f32[1,512], index: 3, kind: input, shape index: {}]   ;;  %s4841_s4 = inlined_call_operand.hbm [shape: bf16[128,512], index: 4, kind: input, shape index: {}]   ;;  %s4842_s5 = inlined_call_operand.hbm [shape: bf16[128,512], index: 5, kind: input, shape index: {}]   ;;  %s4843_s6 = inlined_call_operand.vmem [shape: f32[1,512], index: 6, kind: input, shape index: {}]   ;;  %s4844_s7 = inlined_call_operand.vmem [shape: bf16[128,8], index: 7, kind: input, shape index: {}]   ;;  %s4845_s8 = inlined_call_operand.vmem [shape: f32[1,8], index: 8, kind: input, shape index: {}]   ;;  %s4846_s9 = inlined_call_operand.vmem [shape: f32[8,8], index: 9, kind: output, shape index: {}]  }
   0x1   :  { %15 = vsyncpa [#allocation9], 0 }
   0x2   :  { %16 = vsyncpa [#allocation12], 0  ;;  %s3980_s30 = smov 0  }
   0x3 LB: > { %s3986_s10 = sadd.s32 4294967295, %s3916_s30   ;;  %p2812_p0 = scmp.ge.s32.totalorder %s3916_s30, 1  ;;  %s3916_s30 = sphi %s3980_s30, %s22_s30  }
   0x4   : > { %p242_p1 = scmp.lt.s32.totalorder %s3916_s30, 3  ;;  %p2813_p2 = scmp.ne.s32.totalorder %s3986_s10, 0 }
   0x5   : > { %p3492_p3 = scmp.eq.s32.totalorder %s3986_s10, 0  ;;  %s3918_s12 = smov [#allocation8]  }
   0x6   : > { %p3992_p4 = pnand %p2812_p0, %p242_p1  ;;  %s267_s13 = sshll.u32 %s3918_s12, 4  ;;  %s268_s13 = int_to_ptr.vmem [resolvable:$true] %s267_s13 }
   0x7   : > { %s3919_s14 = smov [#allocation6]   ;;  %s3920_s17 = smov [#allocation10]  }
   0x8   : > { %p3479_p5 = pneg %p3992_p4  ;;  %s254_s15 = sshll.u32 %s3919_s14, 4  ;;  %s3998_s15 = int_to_ptr.vmem [resolvable:$true] %s254_s15 }
   0x9   : > { %s283_s18 = sshll.u32 %s3920_s17, 4  ;;  %s3921_s19 = smov [#allocation11]   ;;  %s4006_s18 = int_to_ptr.vmem [resolvable:$true] %s283_s18 }
   0xa   : > { %p4002_p6 = pnand %p3492_p3, %p3479_p5  ;;  %s4008_s20 = sshll.u32 %s3921_s19, 4  ;;  %s297_s20 = int_to_ptr.vmem [resolvable:$true] %s4008_s20 }
   0xb   : > { %s3805_s21 = scalar_lea.vmem %s268_s13, 4096  ;;  %p3813_p11 = scmp.lt.s32.totalorder %s268_s13, %s268_s13 }
   0xc   : > { %p3796_p7 = pneg %p4002_p6  ;;  %p3806_p8 = scmp.ne.s32.totalorder %s268_s13, %s3805_s21 }
   0xd   : > { %p3814_p12 = scmp.lt.s32.totalorder %s3805_s21, %s3805_s21 }
   0xe   : > { %p3808_p9 = pnand %p3806_p8, %p3796_p7 }
   0xf   : > { %p3815_p13 = por %p3814_p12, %p3813_p11 }
  0x10   : > { %p3809_p10 = pneg %p3808_p9 }
  0x12   : > { %p3816_p0 = pnand %p3815_p13, %p3809_p10 }
  0x14   : > { %3819 = shalt.err (!%p3816_p0)
}
  0x15   : > { %s3922_s22 = smov 256   ;;  %s3923_s23 = smov 16  }
  0x16   : > { %3485 = dma.hbm_to_vmem [thread:$0]  (!%p4002_p6), %s4839_s2, 4096, %s268_s13, [#allocation9], %s3922_s22, %s3922_s22, %s3923_s23  }
  0x17   : > { %s3831_s26 = scalar_lea.vmem %s3998_s15, 512  ;;  %p3839_p9 = scmp.lt.s32.totalorder %s3998_s15, %s3998_s15 }
  0x18   : > { %p3832_p1 = scmp.ne.s32.totalorder %s3998_s15, %s3831_s26  ;;  %p3840_p10 = scmp.lt.s32.totalorder %s3831_s26, %s3831_s26 }
  0x1a   : > { %p3834_p5 = pnand %p3832_p1, %p3796_p7  ;;  %p3841_p11 = por %p3840_p10, %p3839_p9 }
  0x1c   : > { %p3835_p8 = pneg %p3834_p5 }
  0x1e   : > { %p3842_p12 = pnand %p3841_p11, %p3835_p8 }
  0x20   : > { %3845 = shalt.err (!%p3842_p12)
}
  0x21   : > { %3482 = dma.hbm_to_vmem [thread:$0]  (!%p4002_p6), %s4838_s1, 512, %s3998_s15, [#allocation7], %s3922_s22, %s3922_s22, %s3923_s23  }
  0x22   : > { %s3857_s29 = scalar_lea.vmem %s4006_s18, 4096  ;;  %p3865_p5 = scmp.lt.s32.totalorder %s4006_s18, %s4006_s18 }
  0x23   : > { %p3858_p13 = scmp.ne.s32.totalorder %s4006_s18, %s3857_s29  ;;  %p3866_p8 = scmp.lt.s32.totalorder %s3857_s29, %s3857_s29 }
  0x25   : > { %p3860_p0 = pnand %p3858_p13, %p3796_p7  ;;  %p3867_p9 = por %p3866_p8, %p3865_p5 }
  0x27   : > { %p3861_p1 = pneg %p3860_p0 }
  0x29   : > { %p3868_p10 = pnand %p3867_p9, %p3861_p1 }
  0x2b   : > { %3871 = shalt.err (!%p3868_p10)
}
  0x2c   : > { %3488 = dma.hbm_to_vmem [thread:$0]  (!%p4002_p6), %s4841_s4, 4096, %s4006_s18, [#allocation9], %s3922_s22, %s3922_s22, %s3923_s23  }
  0x2d   : > { %s3883_s14 = scalar_lea.vmem %s297_s20, 4096  ;;  %p3891_p0 = scmp.lt.s32.totalorder %s297_s20, %s297_s20 }
  0x2e   : > { %p3884_p11 = scmp.ne.s32.totalorder %s297_s20, %s3883_s14  ;;  %p3892_p1 = scmp.lt.s32.totalorder %s3883_s14, %s3883_s14 }
  0x30   : > { %p3886_p12 = pnand %p3884_p11, %p3796_p7  ;;  %p3893_p5 = por %p3892_p1, %p3891_p0 }
  0x32   : > { %p3887_p13 = pneg %p3886_p12 }
  0x34   : > { %p3894_p8 = pnand %p3893_p5, %p3887_p13 }
  0x36   : > { %3897 = shalt.err (!%p3894_p8)
}
  0x37   : > { %3491 = dma.hbm_to_vmem [thread:$0]  (!%p4002_p6), %s4842_s5, 4096, %s297_s20, [#allocation12], %s3922_s22, %s3922_s22, %s3923_s23  }
  0x38   : > { %330 = sbr.rel (%p3992_p4) target bundleno = 2464 (0x9a0), region = 56 }
  0x3d   : > { %3903 = dma.done.wait (%p3492_p3), [#allocation7], 512  }
  0x3e   : > { %3905 = vsyncadd (%p3492_p3), [#allocation7], 4294966784 }
  0x3f   : > { %3907 = dma.done.wait (%p3492_p3), [#allocation9], 8192  }
  0x40   : > { %3909 = vsyncadd (%p3492_p3), [#allocation9], 4294959104 }
  0x41   : > { %3911 = dma.done.wait (%p3492_p3), [#allocation12], 4096  }
  0x42   : > { %3913 = vsyncadd (%p3492_p3), [#allocation12], 4294963200  ;;  %s2823_s11 = sshll.u32 %s3986_s10, 2 }
  0x43   : > { %p374_p4 = scmp.lt.s32.totalorder %s2823_s11, 7  ;;  %383 = sbr.rel (%p2813_p2) target bundleno = 75 (0x4b), region = 76 }
  0x45   : > { %s4896_s11 = smov (!%p374_p4, %s2823_s11), 7 }
  0x46   : > { %s2824_s16 = sshll.u32 %s4896_s11, 2 }
  0x47   : > { %s4085_s20 = scalar_lea.vmem %s4837_s0, %s2824_s16 }
  0x48   : > { %v3924_v0 = vmov 0.0  }
  0x49   : > { %384 = vst [vmem:[#allocation2] sm:$0xff] %v3924_v0  ;;  %385 = vst [vmem:[#allocation2 + $0x8] sm:$0xff] %v3924_v0 }
  0x4a   : > { %386 = vst [vmem:[#allocation3 + $0x8] sm:$0xff] %v3924_v0  ;;  %387 = vst [vmem:[#allocation3] sm:$0xff] %v3924_v0 }
  0x4b PF: > { %v3520_v1 = vld [vmem:[#allocation6 + $0x4] ss:$16 sps:$4 sm:$0xff]   ;;  %v3522_v2 = vld [vmem:[#allocation6] ss:$16 sps:$4 sm:$0xff]   ;;  %v4851_v3 = vmov 0   ;;  %vm448_vm0 = vcmask 130048   ;;  %v398_v43 = vlaneseq }
  0x4c   : > { %487 = vmatprep.mubr.bf16.mxu0 %v4851_v3  ;;  %540 = vmatprep.mubr.bf16.mxu1 %v4851_v3  ;;  %v3523_v4 = vld [vmem:[#allocation6 + $0xc] ss:$16 sps:$4 sm:$0xff]   ;;  %v3525_v5 = vld [vmem:[%s4085_s20] sm:$0xff]   ;;  %v3526_v6 = vld [vmem:[#allocation6 + $0x8] ss:$16 sps:$4 sm:$0xff]   ;;  %v4853_v11 = vmov 0.0  }
  0x4d   : > { %469 = vmatprep.subr.bf16.mxu0 %v3520_v1  ;;  %522 = vmatprep.subr.bf16.mxu1 %v3523_v4  ;;  %v4092_v7 = vld [vmem:[#allocation8 + $0xe4] ss:$16 sps:$4 sm:$0xff]   ;;  %v4094_v8 = vld [vmem:[#allocation8 + $0xe0] ss:$16 sps:$4 sm:$0xff]   ;;  %v4100_v10 = vld [vmem:[#allocation8 + $0xe8] ss:$16 sps:$4 sm:$0xff]  }
  0x4e   : > { %470 = vmatpush1.bf16.msra.mxu0 %v3522_v2  ;;  %523 = vmatpush1.bf16.msra.mxu1 %v3526_v6  ;;  %v4096_v9 = vld [vmem:[#allocation8 + $0xc4] ss:$16 sps:$4 sm:$0xff]   ;;  %v4104_v12 = vld [vmem:[#allocation8 + $0xc0] ss:$16 sps:$4 sm:$0xff]   ;;  %v4111_v14 = vld [vmem:[#allocation8 + $0xc8] ss:$16 sps:$4 sm:$0xff]  }
  0x4f   : > { %759 = vmatprep.subr.bf16.mxu0 %v4092_v7  ;;  %3123 = vmatprep.subr.bf16.mxu1 %v4853_v11  ;;  %v4108_v13 = vld [vmem:[#allocation8 + $0xa4] ss:$16 sps:$4 sm:$0xff]   ;;  %v4117_v15 = vld [vmem:[#allocation8 + $0xa0] ss:$16 sps:$4 sm:$0xff]   ;;  %v4123_v17 = vld [vmem:[#allocation8 + $0xa8] ss:$16 sps:$4 sm:$0xff]  }
  0x50   : > { %v4120_v16 = vld [vmem:[#allocation8 + $0x84] ss:$16 sps:$4 sm:$0xff]   ;;  %v4126_v18 = vld [vmem:[#allocation8 + $0x80] ss:$16 sps:$4 sm:$0xff]   ;;  %v3546_v19 = vld [vmem:[%s4085_s20 + $0x8] sm:$0xff]   ;;  %vm3927_vm1 = vmmov 0  }
  0x51   : > { %2832 = vmatmul.mubr.msk.bf16.vlgmr.msra.gmra.mxu0 %vm448_vm0, %v3525_v5  ;;  %2834 = vmatmul.mubr.msk.bf16.vlgmr.msra.gmra.mxu1 %vm448_vm0, %v3525_v5  ;;  %v4131_v20 = vld [vmem:[#allocation8 + $0x64] ss:$16 sps:$4 sm:$0xff]   ;;  %v4134_v21 = vld [vmem:[#allocation8 + $0x88] ss:$16 sps:$4 sm:$0xff]   ;;  %v4140_v22 = vld [vmem:[#allocation8 + $0x60] ss:$16 sps:$4 sm:$0xff]  }
  0x52   : > { %760 = vmatpush1.bf16.msra.mxu0 %v4094_v8  ;;  %3124 = vmatpush3.bf16.msra.mxu1 %v4100_v10  ;;  %v4144_v23 = vld [vmem:[#allocation8 + $0x44] ss:$16 sps:$4 sm:$0xff]   ;;  %v4149_v24 = vld [vmem:[#allocation8 + $0x68] ss:$16 sps:$4 sm:$0xff]   ;;  %v4153_v25 = vld [vmem:[#allocation8 + $0x40] ss:$16 sps:$4 sm:$0xff]  }
  0x53   : > { %761 = vmatprep.subr.bf16.mxu0 %v4096_v9  ;;  %497 = vmatprep.mubr.bf16.mxu0 %v4851_v3  ;;  %v4156_v26 = vld [vmem:[#allocation8 + $0x24] ss:$16 sps:$4 sm:$0xff]   ;;  %v4159_v27 = vld [vmem:[#allocation8 + $0x48] ss:$16 sps:$4 sm:$0xff]   ;;  %v4163_v28 = vld [vmem:[#allocation8 + $0x20] ss:$16 sps:$4 sm:$0xff]  }
  0x54   : > { %3125 = vmatprep.subr.bf16.mxu1 %v4853_v11  ;;  %550 = vmatprep.mubr.bf16.mxu1 %v4851_v3  ;;  %v4166_v29 = vld [vmem:[#allocation8 + $0x4] ss:$16 sps:$4 sm:$0xff]   ;;  %v4169_v30 = vld [vmem:[#allocation8 + $0x28] ss:$16 sps:$4 sm:$0xff]   ;;  %v4172_v31 = vld [vmem:[#allocation8] ss:$16 sps:$4 sm:$0xff]  }
  0x55   : > { %v625_v32 = vld [vmem:[#allocation2] sm:$0xff]  ;;  %v4175_v33 = vld [vmem:[#allocation8 + $0x8] ss:$16 sps:$4 sm:$0xff]   ;;  %v4179_v34 = vld [vmem:[#allocation8 + $0xec] ss:$16 sps:$4 sm:$0xff]   ;;  %v4253_v44 = vshrl.u32 %v398_v43, 7 }
  0x56   : > { %762 = vmatpush1.bf16.msra.mxu0 %v4104_v12  ;;  %3126 = vmatpush3.bf16.msra.mxu1 %v4111_v14  ;;  %v627_v35 = vpack.c.bf16 %v625_v32, %v625_v32  ;;  %v4185_v36 = vld [vmem:[#allocation8 + $0xcc] ss:$16 sps:$4 sm:$0xff]   ;;  %v396_v47 = vld [vmem:[%s4840_s3] sm:$0xf]  ;;  %p2958_p2 = scmp.ne.s32.totalorder %s3986_s10, 1 }
  0x57   : > { %763 = vmatprep.subr.bf16.mxu0 %v4108_v13  ;;  %3127 = vmatprep.subr.bf16.mxu1 %v4853_v11  ;;  %v4192_v37 = vld [vmem:[#allocation8 + $0xac] ss:$16 sps:$4 sm:$0xff]   ;;  %4859 = vst [vmem:[#allocation16_spill] sm:$0xff] %v4253_v44  ;;  %v4850_v45 = vsub.s32 0, %v4253_v44  ;;  %v4848_v46 = vsub.s32 2, %v4253_v44  ;;  %v4849_v49 = vsub.s32 1, %v4253_v44 }
  0x58   : > { %v4199_v38 = vld [vmem:[#allocation8 + $0x8c] ss:$16 sps:$4 sm:$0xff]   ;;  %v4847_v50 = vsub.s32 3, %v4253_v44 }
  0x59   : > { %2833 = vmatmul.mubr.msk.bf16.gmra.mxu0 %vm448_vm0, %v3546_v19  ;;  %2835 = vmatmul.mubr.msk.bf16.gmra.mxu1 %vm448_vm0, %v3546_v19  ;;  %v4205_v39 = vld [vmem:[#allocation8 + $0x6c] ss:$16 sps:$4 sm:$0xff]   ;;  %v401_v53 = vrot.slane %v396_v47, %v4850_v45  ;;  %v409_v54 = vrot.slane %v396_v47, %v4848_v46  ;;  %v405_v57 = vrot.slane %v396_v47, %v4849_v49 }
  0x5a   : > { %764 = vmatpush1.bf16.msra.mxu0 %v4117_v15  ;;  %3128 = vmatpush3.bf16.msra.mxu1 %v4123_v17  ;;  %v4211_v40 = vld [vmem:[#allocation8 + $0x4c] ss:$16 sps:$4 sm:$0xff]   ;;  %v413_v59 = vrot.slane %v396_v47, %v4847_v50 }
  0x5b   : > { %765 = vmatprep.subr.bf16.mxu0 %v4120_v16  ;;  %3129 = vmatprep.subr.bf16.mxu1 %v4853_v11  ;;  %v4220_v41 = vld [vmem:[#allocation8 + $0x2c] ss:$16 sps:$4 sm:$0xff]  }
  0x5c   : > { %791 = vmatprep.mubr.bf16.mxu0 %v4851_v3  ;;  %3139 = vmatprep.mubr.msk.bf16.mxu1 %vm3927_vm1, %v4853_v11  ;;  %v4226_v42 = vld [vmem:[#allocation8 + $0xc] ss:$16 sps:$4 sm:$0xff]  }
  0x5e   : > { %766 = vmatpush1.bf16.msra.mxu0 %v4126_v18  ;;  %3130 = vmatpush3.bf16.msra.mxu1 %v4134_v21 }
  0x5f   : > { %767 = vmatprep.subr.bf16.mxu0 %v4131_v20  ;;  %3131 = vmatprep.subr.bf16.mxu1 %v4853_v11 }
  0x62   : > { %768 = vmatpush1.bf16.msra.mxu0 %v4140_v22  ;;  %3132 = vmatpush3.bf16.msra.mxu1 %v4149_v24 }
  0x63   : > { %769 = vmatprep.subr.bf16.mxu0 %v4144_v23  ;;  %3133 = vmatprep.subr.bf16.mxu1 %v4853_v11 }
  0x66   : > { %770 = vmatpush1.bf16.msra.mxu0 %v4153_v25  ;;  %3134 = vmatpush3.bf16.msra.mxu1 %v4159_v27 }
  0x67   : > { %771 = vmatprep.subr.bf16.mxu0 %v4156_v26  ;;  %3135 = vmatprep.subr.bf16.mxu1 %v4853_v11 }
  0x6a   : > { %772 = vmatpush1.bf16.msra.mxu0 %v4163_v28  ;;  %3136 = vmatpush3.bf16.msra.mxu1 %v4169_v30 }
  0x6b   : > { %773 = vmatprep.subr.bf16.mxu0 %v4166_v29  ;;  %3137 = vmatprep.subr.bf16.mxu1 %v4853_v11 }
  0x6e   : > { %774 = vmatpush1.bf16.msra.mxu0 %v4172_v31  ;;  %3138 = vmatpush3.bf16.msra.mxu1 %v4175_v33 }
  0x6f   : > { %3143 = vmatprep.subr.bf16.mxu0 %v4853_v11  ;;  %962 = vmatprep.subr.bf16.mxu1 %v4092_v7 }
  0x71   : > { %792 = vmatmul.mubr.bf16.vlgmr.msra.gmra.mxu0 %v627_v35  ;;  %3140 = vmatmul.mubr.bf16.vlgmr.msra.gmra.mxu1 %v627_v35 }
  0x72   : > { %3144 = vmatpush3.bf16.msra.mxu0 %v4179_v34  ;;  %3159 = vmatprep.mubr.msk.bf16.mxu0 %vm3927_vm1, %v4853_v11 }
  0x73   : > { %3145 = vmatprep.subr.bf16.mxu0 %v4853_v11  ;;  %963 = vmatpush1.bf16.msra.mxu1 %v4094_v8 }
  0x74   : > { %994 = vmatprep.mubr.bf16.mxu1 %v4851_v3  ;;  %964 = vmatprep.subr.bf16.mxu1 %v4096_v9 }
  0x76   : > { %3146 = vmatpush3.bf16.msra.mxu0 %v4185_v36 }
  0x77   : > { %3147 = vmatprep.subr.bf16.mxu0 %v4853_v11  ;;  %965 = vmatpush1.bf16.msra.mxu1 %v4104_v12 }
  0x78   : > { %966 = vmatprep.subr.bf16.mxu1 %v4108_v13 }
  0x7a   : > { %3148 = vmatpush3.bf16.msra.mxu0 %v4192_v37 }
  0x7b   : > { %3149 = vmatprep.subr.bf16.mxu0 %v4853_v11  ;;  %967 = vmatpush1.bf16.msra.mxu1 %v4117_v15 }
  0x7c   : > { %968 = vmatprep.subr.bf16.mxu1 %v4120_v16 }
  0x7e   : > { %3150 = vmatpush3.bf16.msra.mxu0 %v4199_v38 }
  0x7f   : > { %3151 = vmatprep.subr.bf16.mxu0 %v4853_v11  ;;  %969 = vmatpush1.bf16.msra.mxu1 %v4126_v18 }
  0x80   : > { %970 = vmatprep.subr.bf16.mxu1 %v4131_v20 }
  0x82   : > { %3152 = vmatpush3.bf16.msra.mxu0 %v4205_v39 }
  0x83   : > { %3153 = vmatprep.subr.bf16.mxu0 %v4853_v11  ;;  %971 = vmatpush1.bf16.msra.mxu1 %v4140_v22 }
  0x84   : > { %972 = vmatprep.subr.bf16.mxu1 %v4144_v23 }
  0x86   : > { %3154 = vmatpush3.bf16.msra.mxu0 %v4211_v40 }
  0x87   : > { %3155 = vmatprep.subr.bf16.mxu0 %v4853_v11  ;;  %973 = vmatpush1.bf16.msra.mxu1 %v4153_v25 }
  0x88   : > { %974 = vmatprep.subr.bf16.mxu1 %v4156_v26 }
  0x8a   : > { %3156 = vmatpush3.bf16.msra.mxu0 %v4220_v41 }
  0x8b   : > { %3157 = vmatprep.subr.bf16.mxu0 %v4853_v11  ;;  %975 = vmatpush1.bf16.msra.mxu1 %v4163_v28 }
  0x8c   : > { %976 = vmatprep.subr.bf16.mxu1 %v4166_v29 }
  0x8e   : > { %3158 = vmatpush3.bf16.msra.mxu0 %v4226_v42 }
  0x8f   : > { %3163 = vmatprep.subr.bf16.mxu0 %v4853_v11  ;;  %977 = vmatpush1.bf16.msra.mxu1 %v4172_v31 }
  0x90   : > { %3183 = vmatprep.subr.bf16.mxu1 %v4853_v11 }
  0x91   : > { %3160 = vmatmul.mubr.bf16.vlgmr.msra.gmra.mxu0 %v627_v35 }
  0x92   : > { %3164 = vmatpush3.bf16.msra.mxu0 %v4100_v10  ;;  %3179 = vmatprep.mubr.msk.bf16.mxu0 %vm3927_vm1, %v4853_v11 }
  0x93   : > { %3165 = vmatprep.subr.bf16.mxu0 %v4853_v11 }
  0x96   : > { %3166 = vmatpush3.bf16.msra.mxu0 %v4111_v14 }
  0x97   : > { %3167 = vmatprep.subr.bf16.mxu0 %v4853_v11 }
  0x9a   : > { %3168 = vmatpush3.bf16.msra.mxu0 %v4123_v17 }
  0x9b   : > { %3169 = vmatprep.subr.bf16.mxu0 %v4853_v11 }
  0x9e   : > { %3170 = vmatpush3.bf16.msra.mxu0 %v4134_v21 }
  0x9f   : > { %3171 = vmatprep.subr.bf16.mxu0 %v4853_v11 }
  0xa2   : > { %3172 = vmatpush3.bf16.msra.mxu0 %v4149_v24 }
  0xa3   : > { %3173 = vmatprep.subr.bf16.mxu0 %v4853_v11 }
  0xa6   : > { %3174 = vmatpush3.bf16.msra.mxu0 %v4159_v27 }
  0xa7   : > { %3175 = vmatprep.subr.bf16.mxu0 %v4853_v11 }
  0xaa   : > { %3176 = vmatpush3.bf16.msra.mxu0 %v4169_v30 }
  0xab   : > { %3177 = vmatprep.subr.bf16.mxu0 %v4853_v11 }
  0xae   : > { %3178 = vmatpush3.bf16.msra.mxu0 %v4175_v33 }
  0xaf   : > { %1117 = vmatprep.subr.bf16.mxu0 %v4092_v7 }
 0x111   : > { %v489_v48 = vpop.f32.mrf.mxu0  ;;  %v542_v52 = vpop.f32.mrf.mxu1 }
 0x112   : > { %v490_v49 = vadd.f32 %v489_v48, %v401_v53 }
 0x113   : > { %v491_v51 = vpop.f32.mrf.mxu0  ;;  %v544_v56 = vpop.f32.mrf.mxu1 }
 0x114   : > { %v492_v45 = vadd.f32 %v491_v51, %v405_v57 }
 0x115   : > { %v493_v55 = vpop.f32.mrf.mxu0  ;;  %v546_v61 = vpop.f32.mrf.mxu1 }
 0x116   : > { %v4268_v58 = vadd.f32 %v493_v55, %v401_v53  ;;  %v4274_v63 = vadd.f32 %v546_v61, %v409_v54 }
 0x117   : > { %v495_v60 = vpop.f32.mrf.mxu0  ;;  %v548_v0 = vpop.f32.mrf.mxu1 }
 0x118   : > { %v4272_v62 = vadd.f32 %v495_v60, %v405_v57  ;;  %v4276_v1 = vadd.f32 %v548_v0, %v413_v59 }
 0x119   : > { %v499_v2 = vpop.f32.mrf.mxu0  ;;  %v552_v5 = vpop.f32.mrf.mxu1 }
 0x11a   : > { %v4278_v4 = vadd.f32 %v499_v2, %v401_v53  ;;  %v4280_v19 = vadd.f32 %v552_v5, %v409_v54 }
 0x11b   : > { %v501_v6 = vpop.f32.mrf.mxu0  ;;  %v554_v35 = vpop.f32.mrf.mxu1 }
 0x11c   : > { %4860 = vst [vmem:[#allocation17_spill] sm:$0xff] %v4280_v19  ;;  %v4282_v32 = vadd.f32 %v501_v6, %v405_v57  ;;  %v4284_v47 = vadd.f32 %v554_v35, %v413_v59 }
 0x11d   : > { %v503_v43 = vpop.f32.mrf.mxu0  ;;  %v556_v60 = vpop.f32.mrf.mxu1 }
 0x11e   : > { %4861 = vst [vmem:[#allocation18_spill] sm:$0xff] %v4282_v32  ;;  %4862 = vst [vmem:[#allocation19_spill] sm:$0xff] %v4284_v47  ;;  %v4286_v55 = vadd.f32 %v503_v43, %v401_v53  ;;  %v4288_v50 = vadd.f32 %v556_v60, %v409_v54 }
 0x11f   : > { %v505_v61 = vpop.f32.mrf.mxu0  ;;  %v558_v2 = vpop.f32.mrf.mxu1 }
 0x120   : > { %4863 = vst [vmem:[#allocation20_spill] sm:$0xff] %v4286_v55  ;;  %4864 = vst [vmem:[#allocation21_spill] sm:$0xff] %v4288_v50  ;;  %v4290_v0 = vadd.f32 %v505_v61, %v405_v57  ;;  %v4292_v46 = vadd.f32 %v558_v2, %v413_v59  ;;  %v543_v2 = vadd.f32 %v542_v52, %v409_v54 }
 0x122   : > { %4865 = vst [vmem:[#allocation22_spill] sm:$0xff] %v4292_v46 }
 0x131   : > { %v793_v5 = vpop.f32.mrf.mxu0  ;;  %v834_v11 = vpop.f32.mrf.mxu1 }
 0x132   : > { %v840_v6 = vadd.f32 %v793_v5, %v490_v49  ;;  %v842_v51 = vadd.f32 %v834_v11, %v543_v2  ;;  %v545_v49 = vadd.f32 %v544_v56, %v413_v59 }
 0x133   : > { %v795_v3 = vpop.f32.mrf.mxu0  ;;  %v3141_v47 = vpop.f32.mrf.mxu1 }
 0x134   : > { %v841_v44 = vadd.f32 %v795_v3, %v492_v45  ;;  %v2868_v55 = vmul.f32 -1.442695, %v840_v6  ;;  %v626_v47 = vld [vmem:[#allocation3 + $0x8] sm:$0xff] }
 0x135   : > { %v797_v35 = vpop.f32.mrf.mxu0  ;;  %v837_v32 = vpop.f32.mrf.mxu1 }
 0x136   : > { %v2869_v43 = vmul.f32 -1.442695, %v841_v44 }
 0x137   : > { %v798_v19 = vpop.f32.mrf.mxu0  ;;  %v3142_v60 = vpop.f32.mrf.mxu1 }
 0x138   : > { %3658 = vpow2.f32 %v2869_v43  ;;  %v4866_v43 = vmov 0.0   ;;  %v4867_v60 = vmov 0  }
 0x139   : > { %3660 = vpow2.f32 %v2868_v55 }
 0x145   : > { %v3659_v61 = vpop.eup %3658 }
 0x146   : > { %v3661_v50 = vpop.eup %3660  ;;  %v942_v46 = vadd.f32 1.0, %v3659_v61 }
 0x147   : > { %v936_v48 = vadd.f32 1.0, %v3661_v50 }
 0x148   : > { %3662 = vrcp.f32 %v942_v46 }
 0x149   : > { %3664 = vrcp.f32 %v936_v48 }
 0x14a   : > { %3666 = vtanh.f32 %v842_v51 }
 0x151   : > { %v926_v3 = vpop.f32.mrf.mxu0 }
 0x152   : > { %v932_v45 = vadd.f32 %v926_v3, %v545_v49 }
 0x153   : > { %v3161_v53 = vpop.f32.mrf.mxu0 }
 0x154   : > { %v2870_v44 = vmul.f32 -1.442695, %v932_v45 }
 0x155   : > { %v929_v57 = vpop.f32.mrf.mxu0  ;;  %v3663_v32 = vpop.eup %3662 }
 0x156   : > { %3668 = vpow2.f32 %v2870_v44  ;;  %v3665_v55 = vpop.eup %3664  ;;  %v946_v5 = vmul.f32 %v3663_v32, %v626_v47 }
 0x157   : > { %v3162_v19 = vpop.f32.mrf.mxu0  ;;  %v3667_v6 = vpop.eup %3666 }
 0x158   : > { %v947_v52 = vmul.f32 %v3667_v6, %v3665_v55 }
 0x15a   : > { %v4294_v54 = vadd.f32 %v947_v52, %v946_v5 }
 0x15c   : > { %3670 = vtanh.f32 %v4294_v54 }
 0x163   : > { %v3669_v46 = vpop.eup %3668 }
 0x164   : > { %v952_v11 = vadd.f32 1.0, %v3669_v46 }
 0x166   : > { %3672 = vrcp.f32 %v952_v11 }
 0x169   : > { %v3671_v50 = vpop.eup %3670 }
 0x173   : > { %v3673_v56 = vpop.eup %3672 }
 0x174   : > { %v956_v59 = vmul.f32 %v3673_v56, %v3671_v50 }
 0x176   : > { %v957_v35 = vpack.c.bf16 %v956_v59, %v956_v59 }
 0x178   : > { %958 = vst [vmem:[#allocation4] sm:$0xf] %v957_v35  ;;  %995 = vmatmul.mubr.bf16.vlgmr.msra.gmra.mxu1 %v957_v35  ;;  %3180 = vmatmul.mubr.bf16.vlgmr.msra.gmra.mxu0 %v957_v35 }
 0x179   : > { %3184 = vmatpush3.bf16.msra.mxu1 %v4179_v34  ;;  %3199 = vmatprep.mubr.msk.bf16.mxu1 %vm3927_vm1, %v4866_v43 }
 0x17a   : > { %3185 = vmatprep.subr.bf16.mxu1 %v4866_v43  ;;  %1118 = vmatpush1.bf16.msra.mxu0 %v4094_v8 }
 0x17b   : > { %1119 = vmatprep.subr.bf16.mxu0 %v4096_v9  ;;  %1149 = vmatprep.mubr.bf16.mxu0 %v4867_v60 }
 0x17d   : > { %3186 = vmatpush3.bf16.msra.mxu1 %v4185_v36 }
 0x17e   : > { %3187 = vmatprep.subr.bf16.mxu1 %v4866_v43  ;;  %1120 = vmatpush1.bf16.msra.mxu0 %v4104_v12 }
 0x17f   : > { %1121 = vmatprep.subr.bf16.mxu0 %v4108_v13 }
 0x181   : > { %3188 = vmatpush3.bf16.msra.mxu1 %v4192_v37 }
 0x182   : > { %3189 = vmatprep.subr.bf16.mxu1 %v4866_v43  ;;  %1122 = vmatpush1.bf16.msra.mxu0 %v4117_v15 }
 0x183   : > { %1123 = vmatprep.subr.bf16.mxu0 %v4120_v16 }
 0x185   : > { %3190 = vmatpush3.bf16.msra.mxu1 %v4199_v38 }
 0x186   : > { %3191 = vmatprep.subr.bf16.mxu1 %v4866_v43  ;;  %1124 = vmatpush1.bf16.msra.mxu0 %v4126_v18 }
 0x187   : > { %1125 = vmatprep.subr.bf16.mxu0 %v4131_v20 }
 0x189   : > { %3192 = vmatpush3.bf16.msra.mxu1 %v4205_v39 }
 0x18a   : > { %3193 = vmatprep.subr.bf16.mxu1 %v4866_v43  ;;  %1126 = vmatpush1.bf16.msra.mxu0 %v4140_v22 }
 0x18b   : > { %1127 = vmatprep.subr.bf16.mxu0 %v4144_v23 }
 0x18d   : > { %3194 = vmatpush3.bf16.msra.mxu1 %v4211_v40 }
 0x18e   : > { %3195 = vmatprep.subr.bf16.mxu1 %v4866_v43  ;;  %1128 = vmatpush1.bf16.msra.mxu0 %v4153_v25 }
 0x18f   : > { %1129 = vmatprep.subr.bf16.mxu0 %v4156_v26 }
 0x191   : > { %3196 = vmatpush3.bf16.msra.mxu1 %v4220_v41 }
 0x192   : > { %3197 = vmatprep.subr.bf16.mxu1 %v4866_v43  ;;  %1130 = vmatpush1.bf16.msra.mxu0 %v4163_v28 }
 0x193   : > { %1131 = vmatprep.subr.bf16.mxu0 %v4166_v29 }
 0x195   : > { %3198 = vmatpush3.bf16.msra.mxu1 %v4226_v42 }
 0x196   : > { %3203 = vmatprep.subr.bf16.mxu1 %v4866_v43  ;;  %1132 = vmatpush1.bf16.msra.mxu0 %v4172_v31 }
 0x197   : > { %3223 = vmatprep.subr.bf16.mxu0 %v4866_v43 }
 0x198   : > { %3200 = vmatmul.mubr.bf16.vlgmr.msra.gmra.mxu1 %v957_v35 }
 0x199   : > { %3204 = vmatpush3.bf16.msra.mxu1 %v4100_v10  ;;  %3219 = vmatprep.mubr.msk.bf16.mxu1 %vm3927_vm1, %v4866_v43 }
 0x19a   : > { %3205 = vmatprep.subr.bf16.mxu1 %v4866_v43 }
 0x19d   : > { %3206 = vmatpush3.bf16.msra.mxu1 %v4111_v14 }
 0x19e   : > { %3207 = vmatprep.subr.bf16.mxu1 %v4866_v43 }
 0x1a1   : > { %3208 = vmatpush3.bf16.msra.mxu1 %v4123_v17 }
 0x1a2   : > { %3209 = vmatprep.subr.bf16.mxu1 %v4866_v43 }
 0x1a5   : > { %3210 = vmatpush3.bf16.msra.mxu1 %v4134_v21 }
 0x1a6   : > { %3211 = vmatprep.subr.bf16.mxu1 %v4866_v43 }
 0x1a9   : > { %3212 = vmatpush3.bf16.msra.mxu1 %v4149_v24 }
 0x1aa   : > { %3213 = vmatprep.subr.bf16.mxu1 %v4866_v43 }
 0x1ad   : > { %3214 = vmatpush3.bf16.msra.mxu1 %v4159_v27 }
 0x1ae   : > { %3215 = vmatprep.subr.bf16.mxu1 %v4866_v43 }
 0x1b1   : > { %3216 = vmatpush3.bf16.msra.mxu1 %v4169_v30 }
 0x1b2   : > { %3217 = vmatprep.subr.bf16.mxu1 %v4866_v43 }
 0x1b5   : > { %3218 = vmatpush3.bf16.msra.mxu1 %v4175_v33 }
 0x1b6   : > { %1272 = vmatprep.subr.bf16.mxu1 %v4092_v7 }
 0x238   : > { %v996_v61 = vpop.f32.mrf.mxu1  ;;  %v1037_v2 = vpop.f32.mrf.mxu0 }
 0x239   : > { %v1043_v48 = vadd.f32 %v996_v61, %v4268_v58  ;;  %v1045_v47 = vadd.f32 %v1037_v2, %v4274_v63 }
 0x23a   : > { %v998_v51 = vpop.f32.mrf.mxu1  ;;  %v3181_v49 = vpop.f32.mrf.mxu0 }
 0x23b   : > { %v2871_v3 = vmul.f32 -1.442695, %v1043_v48  ;;  %v1044_v45 = vadd.f32 %v998_v51, %v4272_v62 }
 0x23c   : > { %v1000_v53 = vpop.f32.mrf.mxu1  ;;  %v1040_v44 = vpop.f32.mrf.mxu0 }
 0x23d   : > { %3674 = vpow2.f32 %v2871_v3  ;;  %v2872_v57 = vmul.f32 -1.442695, %v1044_v45 }
 0x23e   : > { %v1001_v19 = vpop.f32.mrf.mxu1  ;;  %v3182_v32 = vpop.f32.mrf.mxu0 }
 0x23f   : > { %3676 = vpow2.f32 %v2872_v57 }
 0x240   : > { %3678 = vtanh.f32 %v1045_v47 }
 0x24a   : > { %v3675_v55 = vpop.eup %3674 }
 0x24b   : > { %v1091_v7 = vadd.f32 1.0, %v3675_v55 }
 0x24c   : > { %v3677_v5 = vpop.eup %3676 }
 0x24d   : > { %3680 = vrcp.f32 %v1091_v7  ;;  %v1097_v58 = vadd.f32 1.0, %v3677_v5  ;;  %v3679_v52 = vpop.eup %3678 }
 0x24f   : > { %3682 = vrcp.f32 %v1097_v58 }
 0x258   : > { %v1081_v6 = vpop.f32.mrf.mxu1 }
 0x259   : > { %v1087_v62 = vadd.f32 %v1081_v6, %v4276_v1 }
 0x25a   : > { %v3681_v46 = vpop.eup %3680  ;;  %v3201_v11 = vpop.f32.mrf.mxu1 }
 0x25b   : > { %v1102_v50 = vmul.f32 %v3681_v46, %v3679_v52  ;;  %v2873_v56 = vmul.f32 -1.442695, %v1087_v62  ;;  %v3568_v46 = vld [vmem:[#allocation10 + $0xe0] ss:$16 sps:$4 sm:$0xff]  }
 0x25c   : > { %v3683_v59 = vpop.eup %3682  ;;  %v1084_v35 = vpop.f32.mrf.mxu1 }
 0x25d   : > { %v1101_v61 = vmul.f32 %v3683_v59, %v4294_v54  ;;  %3684 = vpow2.f32 %v2873_v56  ;;  %v3571_v56 = vld [vmem:[#allocation10 + $0xc0] ss:$16 sps:$4 sm:$0xff]   ;;  %v3576_v59 = vld [vmem:[#allocation10 + $0xa4] ss:$16 sps:$4 sm:$0xff]  }
 0x25e   : > { %v3202_v63 = vpop.f32.mrf.mxu1  ;;  %v3574_v35 = vld [vmem:[#allocation10 + $0xa0] ss:$16 sps:$4 sm:$0xff]  }
 0x25f   : > { %v4355_v2 = vadd.f32 %v1102_v50, %v1101_v61  ;;  %v3573_v50 = vld [vmem:[#allocation10 + $0xc4] ss:$16 sps:$4 sm:$0xff]  }
 0x260   : > { %v3579_v61 = vld [vmem:[#allocation10 + $0x84] ss:$16 sps:$4 sm:$0xff]  }
 0x261   : > { %3686 = vtanh.f32 %v4355_v2  ;;  %v3582_v63 = vld [vmem:[#allocation10 + $0x64] ss:$16 sps:$4 sm:$0xff]  }
 0x26a   : > { %v3685_v48 = vpop.eup %3684 }
 0x26b   : > { %v1107_v51 = vadd.f32 1.0, %v3685_v48  ;;  %v3583_v48 = vld [vmem:[#allocation10 + $0x40] ss:$16 sps:$4 sm:$0xff]  }
 0x26d   : > { %3688 = vrcp.f32 %v1107_v51  ;;  %v3586_v51 = vld [vmem:[#allocation10 + $0x20] ss:$16 sps:$4 sm:$0xff]  }
 0x26e   : > { %v3687_v49 = vpop.eup %3686 }
 0x27a   : > { %v3689_v3 = vpop.eup %3688 }
 0x27b   : > { %v1111_v1 = vmul.f32 %v3689_v3, %v3687_v49  ;;  %v3589_v49 = vld [vmem:[#allocation10] ss:$16 sps:$4 sm:$0xff]   ;;  %v3593_v3 = vld [vmem:[#allocation10 + $0xe8] ss:$16 sps:$4 sm:$0xff]  }
 0x27d   : > { %v1112_v45 = vpack.c.bf16 %v1111_v1, %v1111_v1 }
 0x27f   : > { %1113 = vst [vmem:[#allocation4 + $0x4] sm:$0xf] %v1112_v45  ;;  %1150 = vmatmul.mubr.bf16.vlgmr.msra.gmra.mxu0 %v1112_v45  ;;  %3220 = vmatmul.mubr.bf16.vlgmr.msra.gmra.mxu1 %v1112_v45 }
 0x280   : > { %3224 = vmatpush3.bf16.msra.mxu0 %v4179_v34  ;;  %3239 = vmatprep.mubr.msk.bf16.mxu0 %vm3927_vm1, %v4866_v43 }
 0x281   : > { %3225 = vmatprep.subr.bf16.mxu0 %v4866_v43  ;;  %1273 = vmatpush1.bf16.msra.mxu1 %v4094_v8  ;;  %v3570_v8 = vld [vmem:[#allocation10 + $0xe4] ss:$16 sps:$4 sm:$0xff]  }
 0x282   : > { %1274 = vmatprep.subr.bf16.mxu1 %v4096_v9  ;;  %1304 = vmatprep.mubr.bf16.mxu1 %v4867_v60 }
 0x284   : > { %3226 = vmatpush3.bf16.msra.mxu0 %v4185_v36 }
 0x285   : > { %3227 = vmatprep.subr.bf16.mxu0 %v4866_v43  ;;  %1275 = vmatpush1.bf16.msra.mxu1 %v4104_v12 }
 0x286   : > { %1276 = vmatprep.subr.bf16.mxu1 %v4108_v13  ;;  %v3592_v1 = vld [vmem:[#allocation4] sm:$0xff]  }
 0x288   : > { %3228 = vmatpush3.bf16.msra.mxu0 %v4192_v37 }
 0x289   : > { %3229 = vmatprep.subr.bf16.mxu0 %v4866_v43  ;;  %1277 = vmatpush1.bf16.msra.mxu1 %v4117_v15 }
 0x28a   : > { %1278 = vmatprep.subr.bf16.mxu1 %v4120_v16  ;;  %v4868_v16 = vld [vmem:[#allocation18_spill] sm:$0xff] }
 0x28c   : > { %3230 = vmatpush3.bf16.msra.mxu0 %v4199_v38 }
 0x28d   : > { %3231 = vmatprep.subr.bf16.mxu0 %v4866_v43  ;;  %1279 = vmatpush1.bf16.msra.mxu1 %v4126_v18 }
 0x28e   : > { %1280 = vmatprep.subr.bf16.mxu1 %v4131_v20 }
 0x290   : > { %3232 = vmatpush3.bf16.msra.mxu0 %v4205_v39 }
 0x291   : > { %3233 = vmatprep.subr.bf16.mxu0 %v4866_v43  ;;  %1281 = vmatpush1.bf16.msra.mxu1 %v4140_v22 }
 0x292   : > { %1282 = vmatprep.subr.bf16.mxu1 %v4144_v23 }
 0x294   : > { %3234 = vmatpush3.bf16.msra.mxu0 %v4211_v40 }
 0x295   : > { %3235 = vmatprep.subr.bf16.mxu0 %v4866_v43  ;;  %1283 = vmatpush1.bf16.msra.mxu1 %v4153_v25 }
 0x296   : > { %1284 = vmatprep.subr.bf16.mxu1 %v4156_v26 }
 0x298   : > { %3236 = vmatpush3.bf16.msra.mxu0 %v4220_v41 }
 0x299   : > { %3237 = vmatprep.subr.bf16.mxu0 %v4866_v43  ;;  %1285 = vmatpush1.bf16.msra.mxu1 %v4163_v28 }
 0x29a   : > { %1286 = vmatprep.subr.bf16.mxu1 %v4166_v29 }
 0x29c   : > { %3238 = vmatpush3.bf16.msra.mxu0 %v4226_v42 }
 0x29d   : > { %3243 = vmatprep.subr.bf16.mxu0 %v4866_v43  ;;  %1287 = vmatpush1.bf16.msra.mxu1 %v4172_v31 }
 0x29e   : > { %3263 = vmatprep.subr.bf16.mxu1 %v4866_v43 }
 0x29f   : > { %3240 = vmatmul.mubr.bf16.vlgmr.msra.gmra.mxu0 %v1112_v45  ;;  %v3596_v45 = vld [vmem:[#allocation10 + $0xc8] ss:$16 sps:$4 sm:$0xff]  }
 0x2a0   : > { %3244 = vmatpush3.bf16.msra.mxu0 %v4100_v10  ;;  %3259 = vmatprep.mubr.msk.bf16.mxu0 %vm3927_vm1, %v4866_v43 }
 0x2a1   : > { %3245 = vmatprep.subr.bf16.mxu0 %v4866_v43 }
 0x2a4   : > { %3246 = vmatpush3.bf16.msra.mxu0 %v4111_v14 }
 0x2a5   : > { %3247 = vmatprep.subr.bf16.mxu0 %v4866_v43 }
 0x2a8   : > { %3248 = vmatpush3.bf16.msra.mxu0 %v4123_v17 }
 0x2a9   : > { %3249 = vmatprep.subr.bf16.mxu0 %v4866_v43 }
 0x2ac   : > { %3250 = vmatpush3.bf16.msra.mxu0 %v4134_v21 }
 0x2ad   : > { %3251 = vmatprep.subr.bf16.mxu0 %v4866_v43 }
 0x2b0   : > { %3252 = vmatpush3.bf16.msra.mxu0 %v4149_v24  ;;  %v4869_v24 = vld [vmem:[#allocation17_spill] sm:$0xff] }
 0x2b1   : > { %3253 = vmatprep.subr.bf16.mxu0 %v4866_v43 }
 0x2b4   : > { %3254 = vmatpush3.bf16.msra.mxu0 %v4159_v27 }
 0x2b5   : > { %3255 = vmatprep.subr.bf16.mxu0 %v4866_v43 }
 0x2b8   : > { %3256 = vmatpush3.bf16.msra.mxu0 %v4169_v30 }
 0x2b9   : > { %3257 = vmatprep.subr.bf16.mxu0 %v4866_v43 }
 0x2bc   : > { %3258 = vmatpush3.bf16.msra.mxu0 %v4175_v33  ;;  %v4870_v33 = vld [vmem:[#allocation19_spill] sm:$0xff] }
 0x2bd   : > { %1656 = vmatprep.subr.bf16.mxu0 %v3570_v8  ;;  %v3599_v8 = vld [vmem:[#allocation10 + $0xa8] ss:$16 sps:$4 sm:$0xff]  }
 0x33f   : > { %v1151_v9 = vpop.f32.mrf.mxu0  ;;  %v1192_v10 = vpop.f32.mrf.mxu1 }
 0x340   : > { %v1198_v12 = vadd.f32 %v1151_v9, %v4278_v4  ;;  %v1200_v25 = vadd.f32 %v1192_v10, %v4869_v24  ;;  %v3604_v9 = vld [vmem:[#allocation10 + $0x8c] ss:$16 sps:$4 sm:$0xff]   ;;  %v4451_v24 = vld [vmem:[#allocation11 + $0xc0] ss:$16 sps:$4 sm:$0xff]  }
 0x341   : > { %v1153_v13 = vpop.f32.mrf.mxu0  ;;  %v3221_v14 = vpop.f32.mrf.mxu1  ;;  %v3607_v10 = vld [vmem:[#allocation10 + $0x6c] ss:$16 sps:$4 sm:$0xff]  }
 0x342   : > { %v2874_v15 = vmul.f32 -1.442695, %v1198_v12  ;;  %v1199_v17 = vadd.f32 %v1153_v13, %v4868_v16  ;;  %v3605_v12 = vld [vmem:[#allocation10 + $0x68] ss:$16 sps:$4 sm:$0xff]   ;;  %v3610_v13 = vld [vmem:[#allocation10 + $0x4c] ss:$16 sps:$4 sm:$0xff]  }
 0x343   : > { %v1155_v18 = vpop.f32.mrf.mxu0  ;;  %v1195_v20 = vpop.f32.mrf.mxu1  ;;  %v3608_v14 = vld [vmem:[#allocation10 + $0x48] ss:$16 sps:$4 sm:$0xff]  }
 0x344   : > { %3690 = vpow2.f32 %v2874_v15  ;;  %v2875_v21 = vmul.f32 -1.442695, %v1199_v17  ;;  %v3613_v15 = vld [vmem:[#allocation10 + $0x2c] ss:$16 sps:$4 sm:$0xff]   ;;  %v3611_v16 = vld [vmem:[#allocation10 + $0x28] ss:$16 sps:$4 sm:$0xff]  }
 0x345   : > { %v1156_v22 = vpop.f32.mrf.mxu0  ;;  %v3222_v23 = vpop.f32.mrf.mxu1  ;;  %v3616_v17 = vld [vmem:[#allocation10 + $0xc] ss:$16 sps:$4 sm:$0xff]   ;;  %v3614_v18 = vld [vmem:[#allocation10 + $0x8] ss:$16 sps:$4 sm:$0xff]   ;;  %v4440_v20 = vld [vmem:[#allocation11 + $0xe4] ss:$16 sps:$4 sm:$0xff]  }
 0x346   : > { %3692 = vpow2.f32 %v2875_v21  ;;  %v4442_v21 = vld [vmem:[#allocation11 + $0xe0] ss:$16 sps:$4 sm:$0xff]   ;;  %v4445_v22 = vld [vmem:[#allocation11 + $0xe8] ss:$16 sps:$4 sm:$0xff]   ;;  %v4449_v23 = vld [vmem:[#allocation11 + $0xc4] ss:$16 sps:$4 sm:$0xff]  }
 0x347   : > { %3694 = vtanh.f32 %v1200_v25  ;;  %v4455_v25 = vld [vmem:[#allocation11 + $0xc8] ss:$16 sps:$4 sm:$0xff]  }
 0x351   : > { %v3691_v26 = vpop.eup %3690 }
 0x352   : > { %v1246_v27 = vadd.f32 1.0, %v3691_v26  ;;  %v4459_v26 = vld [vmem:[#allocation11 + $0xa4] ss:$16 sps:$4 sm:$0xff]  }
 0x353   : > { %v3693_v28 = vpop.eup %3692 }
 0x354   : > { %3696 = vrcp.f32 %v1246_v27  ;;  %v1252_v29 = vadd.f32 1.0, %v3693_v28  ;;  %v3695_v31 = vpop.eup %3694  ;;  %v4461_v27 = vld [vmem:[#allocation11 + $0xa0] ss:$16 sps:$4 sm:$0xff]   ;;  %v4465_v28 = vld [vmem:[#allocation11 + $0xa8] ss:$16 sps:$4 sm:$0xff]  }
 0x356   : > { %3698 = vrcp.f32 %v1252_v29  ;;  %v4469_v29 = vld [vmem:[#allocation11 + $0x84] ss:$16 sps:$4 sm:$0xff]  }
 0x35f   : > { %v1236_v30 = vpop.f32.mrf.mxu0 }
 0x360   : > { %v1242_v4 = vadd.f32 %v1236_v30, %v4870_v33  ;;  %v4471_v30 = vld [vmem:[#allocation11 + $0x80] ss:$16 sps:$4 sm:$0xff]   ;;  %v4479_v33 = vld [vmem:[#allocation11 + $0x64] ss:$16 sps:$4 sm:$0xff]  }
 0x361   : > { %v3697_v54 = vpop.eup %3696  ;;  %v3241_v53 = vpop.f32.mrf.mxu0 }
 0x362   : > { %v1257_v44 = vmul.f32 %v3697_v54, %v3695_v31  ;;  %v2876_v57 = vmul.f32 -1.442695, %v1242_v4  ;;  %v4475_v31 = vld [vmem:[#allocation11 + $0x88] ss:$16 sps:$4 sm:$0xff]   ;;  %v4481_v4 = vld [vmem:[#allocation11 + $0x60] ss:$16 sps:$4 sm:$0xff]  }
 0x363   : > { %v3699_v19 = vpop.eup %3698  ;;  %v1239_v32 = vpop.f32.mrf.mxu0  ;;  %v4485_v54 = vld [vmem:[#allocation11 + $0x68] ss:$16 sps:$4 sm:$0xff]   ;;  %v4487_v53 = vld [vmem:[#allocation11 + $0x44] ss:$16 sps:$4 sm:$0xff]  }
 0x364   : > { %v1256_v47 = vmul.f32 %v3699_v19, %v4355_v2  ;;  %3700 = vpow2.f32 %v2876_v57  ;;  %v3580_v2 = vld [vmem:[#allocation10 + $0x60] ss:$16 sps:$4 sm:$0xff]   ;;  %v4494_v57 = vld [vmem:[#allocation11 + $0x48] ss:$16 sps:$4 sm:$0xff]   ;;  %v4496_v19 = vld [vmem:[#allocation11 + $0x24] ss:$16 sps:$4 sm:$0xff]  }
 0x365   : > { %v3242_v55 = vpop.f32.mrf.mxu0  ;;  %v4502_v32 = vld [vmem:[#allocation11 + $0x20] ss:$16 sps:$4 sm:$0xff]  }
 0x366   : > { %v4415_v7 = vadd.f32 %v1257_v44, %v1256_v47  ;;  %v4490_v44 = vld [vmem:[#allocation11 + $0x40] ss:$16 sps:$4 sm:$0xff]   ;;  %v4505_v47 = vld [vmem:[#allocation11 + $0x28] ss:$16 sps:$4 sm:$0xff]   ;;  %v4508_v55 = vld [vmem:[#allocation11 + $0x4] ss:$16 sps:$4 sm:$0xff]  }
 0x368   : > { %3702 = vtanh.f32 %v4415_v7 }
 0x371   : > { %v3701_v5 = vpop.eup %3700 }
 0x372   : > { %v1262_v58 = vadd.f32 1.0, %v3701_v5  ;;  %v4510_v5 = vld [vmem:[#allocation11] ss:$16 sps:$4 sm:$0xff]  }
 0x374   : > { %3704 = vrcp.f32 %v1262_v58  ;;  %v4513_v58 = vld [vmem:[#allocation11 + $0x8] ss:$16 sps:$4 sm:$0xff]  }
 0x375   : > { %v3703_v6 = vpop.eup %3702 }
 0x381   : > { %v3705_v52 = vpop.eup %3704 }
 0x382   : > { %v1266_v62 = vmul.f32 %v3705_v52, %v3703_v6 }
 0x384   : > { %v1267_v11 = vpack.c.bf16 %v1266_v62, %v1266_v62  ;;  %v4871_v62 = vld [vmem:[#allocation20_spill] sm:$0xff] }
 0x386   : > { %1268 = vst [vmem:[#allocation4 + $0x8] sm:$0xf] %v1267_v11  ;;  %1305 = vmatmul.mubr.bf16.vlgmr.msra.gmra.mxu1 %v1267_v11  ;;  %3260 = vmatmul.mubr.bf16.vlgmr.msra.gmra.mxu0 %v1267_v11 }
 0x387   : > { %3264 = vmatpush3.bf16.msra.mxu1 %v4179_v34  ;;  %1657 = vmatpush1.bf16.msra.mxu0 %v3568_v46  ;;  %v3577_v34 = vld [vmem:[#allocation10 + $0x80] ss:$16 sps:$4 sm:$0xff]  }
 0x388   : > { %3265 = vmatprep.subr.bf16.mxu1 %v4866_v43  ;;  %1658 = vmatprep.subr.bf16.mxu0 %v3573_v50 }
 0x389   : > { %3279 = vmatprep.mubr.msk.bf16.mxu1 %vm3927_vm1, %v4866_v43  ;;  %1688 = vmatprep.mubr.bf16.mxu0 %v4867_v60 }
 0x38b   : > { %3266 = vmatpush3.bf16.msra.mxu1 %v4185_v36  ;;  %1659 = vmatpush1.bf16.msra.mxu0 %v3571_v56  ;;  %v3585_v36 = vld [vmem:[#allocation10 + $0x44] ss:$16 sps:$4 sm:$0xff]  }
 0x38c   : > { %3267 = vmatprep.subr.bf16.mxu1 %v4866_v43  ;;  %1660 = vmatprep.subr.bf16.mxu0 %v3576_v59 }
 0x38f   : > { %3268 = vmatpush3.bf16.msra.mxu1 %v4192_v37  ;;  %1661 = vmatpush1.bf16.msra.mxu0 %v3574_v35  ;;  %v3588_v37 = vld [vmem:[#allocation10 + $0x24] ss:$16 sps:$4 sm:$0xff]  }
 0x390   : > { %3269 = vmatprep.subr.bf16.mxu1 %v4866_v43  ;;  %1662 = vmatprep.subr.bf16.mxu0 %v3579_v61 }
 0x393   : > { %3270 = vmatpush3.bf16.msra.mxu1 %v4199_v38  ;;  %1663 = vmatpush1.bf16.msra.mxu0 %v3577_v34  ;;  %v3591_v38 = vld [vmem:[#allocation10 + $0x4] ss:$16 sps:$4 sm:$0xff]  }
 0x394   : > { %3271 = vmatprep.subr.bf16.mxu1 %v4866_v43  ;;  %1664 = vmatprep.subr.bf16.mxu0 %v3582_v63 }
 0x397   : > { %3272 = vmatpush3.bf16.msra.mxu1 %v4205_v39  ;;  %1665 = vmatpush1.bf16.msra.mxu0 %v3580_v2  ;;  %v3595_v39 = vld [vmem:[#allocation10 + $0xec] ss:$16 sps:$4 sm:$0xff]  }
 0x398   : > { %3273 = vmatprep.subr.bf16.mxu1 %v4866_v43  ;;  %1666 = vmatprep.subr.bf16.mxu0 %v3585_v36  ;;  %v4872_v36 = vld [vmem:[#allocation21_spill] sm:$0xff] }
 0x39b   : > { %3274 = vmatpush3.bf16.msra.mxu1 %v4211_v40  ;;  %1667 = vmatpush1.bf16.msra.mxu0 %v3583_v48  ;;  %v3598_v40 = vld [vmem:[#allocation10 + $0xcc] ss:$16 sps:$4 sm:$0xff]  }
 0x39c   : > { %3275 = vmatprep.subr.bf16.mxu1 %v4866_v43  ;;  %1668 = vmatprep.subr.bf16.mxu0 %v3588_v37 }
 0x39f   : > { %3276 = vmatpush3.bf16.msra.mxu1 %v4220_v41  ;;  %1669 = vmatpush1.bf16.msra.mxu0 %v3586_v51  ;;  %v3601_v41 = vld [vmem:[#allocation10 + $0xac] ss:$16 sps:$4 sm:$0xff]  }
 0x3a0   : > { %3277 = vmatprep.subr.bf16.mxu1 %v4866_v43  ;;  %1670 = vmatprep.subr.bf16.mxu0 %v3591_v38 }
 0x3a3   : > { %3278 = vmatpush3.bf16.msra.mxu1 %v4226_v42  ;;  %1671 = vmatpush1.bf16.msra.mxu0 %v3589_v49  ;;  %v3602_v42 = vld [vmem:[#allocation10 + $0x88] ss:$16 sps:$4 sm:$0xff]  }
 0x3a4   : > { %1709 = vmatprep.subr.bf16.mxu1 %v3595_v39  ;;  %1962 = vmatprep.subr.bf16.mxu0 %v4440_v20 }
 0x3a6   : > { %3280 = vmatmul.mubr.bf16.vlgmr.msra.gmra.mxu1 %v1267_v11  ;;  %1689 = vmatmul.mubr.bf16.vlgmr.msra.gmra.mxu0 %v3592_v1 }
 0x3a7   : > { %1710 = vmatpush1.bf16.msra.mxu1 %v3593_v3  ;;  %1741 = vmatprep.mubr.bf16.mxu1 %v4867_v60 }
 0x3a8   : > { %1711 = vmatprep.subr.bf16.mxu1 %v3598_v40  ;;  %1698 = vmatprep.mubr.bf16.mxu0 %v4867_v60 }
 0x3a9   : > { %1963 = vmatpush1.bf16.msra.mxu0 %v4442_v21 }
 0x3aa   : > { %1964 = vmatprep.subr.bf16.mxu0 %v4449_v23 }
 0x3ab   : > { %1712 = vmatpush1.bf16.msra.mxu1 %v3596_v45 }
 0x3ac   : > { %1713 = vmatprep.subr.bf16.mxu1 %v3601_v41 }
 0x3ad   : > { %1965 = vmatpush1.bf16.msra.mxu0 %v4451_v24 }
 0x3ae   : > { %1966 = vmatprep.subr.bf16.mxu0 %v4459_v26 }
 0x3af   : > { %1714 = vmatpush1.bf16.msra.mxu1 %v3599_v8 }
 0x3b0   : > { %1715 = vmatprep.subr.bf16.mxu1 %v3604_v9 }
 0x3b1   : > { %1967 = vmatpush1.bf16.msra.mxu0 %v4461_v27 }
 0x3b2   : > { %1968 = vmatprep.subr.bf16.mxu0 %v4469_v29 }
 0x3b3   : > { %1716 = vmatpush1.bf16.msra.mxu1 %v3602_v42 }
 0x3b4   : > { %1717 = vmatprep.subr.bf16.mxu1 %v3607_v10 }
 0x3b5   : > { %1969 = vmatpush1.bf16.msra.mxu0 %v4471_v30 }
 0x3b6   : > { %1970 = vmatprep.subr.bf16.mxu0 %v4479_v33 }
 0x3b7   : > { %1718 = vmatpush1.bf16.msra.mxu1 %v3605_v12 }
 0x3b8   : > { %1719 = vmatprep.subr.bf16.mxu1 %v3610_v13 }
 0x3b9   : > { %1971 = vmatpush1.bf16.msra.mxu0 %v4481_v4 }
 0x3ba   : > { %1972 = vmatprep.subr.bf16.mxu0 %v4487_v53 }
 0x3bb   : > { %1720 = vmatpush1.bf16.msra.mxu1 %v3608_v14 }
 0x3bc   : > { %1721 = vmatprep.subr.bf16.mxu1 %v3613_v15 }
 0x3bd   : > { %1973 = vmatpush1.bf16.msra.mxu0 %v4490_v44 }
 0x3be   : > { %1974 = vmatprep.subr.bf16.mxu0 %v4496_v19 }
 0x3bf   : > { %1722 = vmatpush1.bf16.msra.mxu1 %v3611_v16 }
 0x3c0   : > { %1723 = vmatprep.subr.bf16.mxu1 %v3616_v17 }
 0x3c1   : > { %1975 = vmatpush1.bf16.msra.mxu0 %v4502_v32 }
 0x3c2   : > { %1976 = vmatprep.subr.bf16.mxu0 %v4508_v55 }
 0x3c3   : > { %1724 = vmatpush1.bf16.msra.mxu1 %v3614_v18 }
 0x3c4   : > { %3283 = vmatprep.subr.bf16.mxu1 %v4866_v43 }
 0x3c5   : > { %1977 = vmatpush1.bf16.msra.mxu0 %v4510_v5 }
 0x3c6   : > { %1742 = vmatmul.mubr.bf16.vlgmr.msra.gmra.mxu1 %v3592_v1  ;;  %3303 = vmatprep.subr.bf16.mxu0 %v4866_v43  ;;  %v4873_v1 = vld [vmem:[#allocation22_spill] sm:$0xff] }
 0x3c7   : > { %1751 = vmatprep.mubr.bf16.mxu1 %v4867_v60  ;;  %3284 = vmatpush3.bf16.msra.mxu1 %v4445_v22 }
 0x3c8   : > { %3285 = vmatprep.subr.bf16.mxu1 %v4866_v43 }
 0x3cb   : > { %3286 = vmatpush3.bf16.msra.mxu1 %v4455_v25 }
 0x3cc   : > { %3287 = vmatprep.subr.bf16.mxu1 %v4866_v43 }
 0x3cf   : > { %3288 = vmatpush3.bf16.msra.mxu1 %v4465_v28 }
 0x3d0   : > { %3289 = vmatprep.subr.bf16.mxu1 %v4866_v43 }
 0x3d3   : > { %3290 = vmatpush3.bf16.msra.mxu1 %v4475_v31 }
 0x3d4   : > { %3291 = vmatprep.subr.bf16.mxu1 %v4866_v43 }
 0x3d7   : > { %3292 = vmatpush3.bf16.msra.mxu1 %v4485_v54 }
 0x3d8   : > { %3293 = vmatprep.subr.bf16.mxu1 %v4866_v43 }
 0x3db   : > { %3294 = vmatpush3.bf16.msra.mxu1 %v4494_v57 }
 0x3dc   : > { %3295 = vmatprep.subr.bf16.mxu1 %v4866_v43 }
 0x3df   : > { %3296 = vmatpush3.bf16.msra.mxu1 %v4505_v47 }
 0x3e0   : > { %3297 = vmatprep.subr.bf16.mxu1 %v4866_v43 }
 0x3e3   : > { %3298 = vmatpush3.bf16.msra.mxu1 %v4513_v58 }
 0x3e4   : > { %2164 = vmatprep.subr.bf16.mxu1 %v4440_v20 }
 0x446   : > { %v1306_v6 = vpop.f32.mrf.mxu1  ;;  %v1347_v52 = vpop.f32.mrf.mxu0 }
 0x447   : > { %v1353_v46 = vadd.f32 %v1306_v6, %v4871_v62  ;;  %v1355_v48 = vadd.f32 %v1347_v52, %v4872_v36 }
 0x448   : > { %v1308_v11 = vpop.f32.mrf.mxu1  ;;  %v3261_v50 = vpop.f32.mrf.mxu0 }
 0x449   : > { %v2877_v56 = vmul.f32 -1.442695, %v1353_v46  ;;  %v1354_v59 = vadd.f32 %v1308_v11, %v4290_v0  ;;  %v4529_v46 = vld [vmem:[#allocation11 + $0xec] ss:$16 sps:$4 sm:$0xff]  }
 0x44a   : > { %v1310_v35 = vpop.f32.mrf.mxu1  ;;  %v1350_v61 = vpop.f32.mrf.mxu0  ;;  %v4532_v11 = vld [vmem:[#allocation11 + $0xcc] ss:$16 sps:$4 sm:$0xff]  }
 0x44b   : > { %3706 = vpow2.f32 %v2877_v56  ;;  %v2878_v34 = vmul.f32 -1.442695, %v1354_v59  ;;  %v4541_v50 = vld [vmem:[#allocation11 + $0xac] ss:$16 sps:$4 sm:$0xff]  }
 0x44c   : > { %v1311_v63 = vpop.f32.mrf.mxu1  ;;  %v3262_v2 = vpop.f32.mrf.mxu0  ;;  %v4547_v56 = vld [vmem:[#allocation11 + $0x8c] ss:$16 sps:$4 sm:$0xff]  }
 0x44d   : > { %3708 = vpow2.f32 %v2878_v34  ;;  %v4553_v59 = vld [vmem:[#allocation11 + $0x6c] ss:$16 sps:$4 sm:$0xff]  }
 0x44e   : > { %3710 = vtanh.f32 %v1355_v48  ;;  %v4559_v35 = vld [vmem:[#allocation11 + $0x4c] ss:$16 sps:$4 sm:$0xff]  }
 0x44f   : > { %v4565_v61 = vld [vmem:[#allocation11 + $0x2c] ss:$16 sps:$4 sm:$0xff]  }
 0x450   : > { %v4571_v34 = vld [vmem:[#allocation11 + $0xc] ss:$16 sps:$4 sm:$0xff]  }
 0x458   : > { %v3707_v37 = vpop.eup %3706 }
 0x459   : > { %v1401_v51 = vadd.f32 1.0, %v3707_v37 }
 0x45a   : > { %v3709_v38 = vpop.eup %3708 }
 0x45b   : > { %3712 = vrcp.f32 %v1401_v51  ;;  %v1407_v49 = vadd.f32 1.0, %v3709_v38  ;;  %v3711_v3 = vpop.eup %3710 }
 0x45d   : > { %3714 = vrcp.f32 %v1407_v49 }
 0x466   : > { %v1391_v39 = vpop.f32.mrf.mxu1  ;;  %v1690_v63 = vpop.f32.mrf.mxu0 }
 0x467   : > { %v1397_v0 = vadd.f32 %v1391_v39, %v4873_v1  ;;  %v1462_v1 = vld [vmem:[%s4843_s6] sm:$0xf] }
 0x468   : > { %v3713_v40 = vpop.eup %3712  ;;  %v3281_v45 = vpop.f32.mrf.mxu1 }
 0x469   : > { %v1412_v41 = vmul.f32 %v3713_v40, %v3711_v3  ;;  %v2879_v8 = vmul.f32 -1.442695, %v1397_v0  ;;  %v1692_v36 = vpop.f32.mrf.mxu0  ;;  %v4878_v45 = vld [vmem:[#allocation16_spill] sm:$0xff] }
 0x46a   : > { %v3715_v9 = vpop.eup %3714  ;;  %v1394_v42 = vpop.f32.mrf.mxu1 }
 0x46b   : > { %v1411_v10 = vmul.f32 %v3715_v9, %v4415_v7  ;;  %3716 = vpow2.f32 %v2879_v8  ;;  %v1827_v7 = vld [vmem:[#allocation2 + $0x8] sm:$0xff]  ;;  %v4598_v37 = vpop.f32.mrf.mxu0 }
 0x46c   : > { %v3282_v12 = vpop.f32.mrf.mxu1  ;;  %v1830_v62 = vpack.c.bf16 %v1827_v7, %v1827_v7 }
 0x46d   : > { %v1413_v13 = vadd.f32 %v1412_v41, %v1411_v10  ;;  %v4602_v38 = vpop.f32.mrf.mxu0  ;;  %v4879_v41 = vsub.s32 0, %v4878_v45  ;;  %v4882_v10 = vsub.s32 1, %v4878_v45 }
 0x46f   : > { %1425 = vst [vmem:[#allocation3 + $0x8] sm:$0xff] %v1413_v13  ;;  %3718 = vtanh.f32 %v1413_v13  ;;  %v4619_v8 = vrot.slane %v1462_v1, %v4879_v41  ;;  %v4627_v12 = vrot.slane %v1462_v1, %v4882_v10 }
 0x478   : > { %v3717_v14 = vpop.eup %3716 }
 0x479   : > { %v1417_v15 = vadd.f32 1.0, %v3717_v14 }
 0x47b   : > { %3720 = vrcp.f32 %v1417_v15  ;;  %v1691_v15 = vadd.f32 %v1690_v63, %v4619_v8 }
 0x47c   : > { %v3719_v16 = vpop.eup %3718 }
 0x486   : > { %v1743_v2 = vpop.f32.mrf.mxu1 }
 0x488   : > { %v3721_v17 = vpop.eup %3720  ;;  %v1745_v48 = vpop.f32.mrf.mxu1 }
 0x489   : > { %v1421_v18 = vmul.f32 %v3721_v17, %v3719_v16 }
 0x48a   : > { %v4600_v51 = vpop.f32.mrf.mxu1 }
 0x48b   : > { %v1422_v6 = vpack.c.bf16 %v1421_v18, %v1421_v18  ;;  %1424 = vst [vmem:[#allocation2] sm:$0xff] %v1421_v18  ;;  %v1693_v18 = vadd.f32 %v1692_v36, %v4627_v12 }
 0x48c   : > { %v4604_v49 = vpop.f32.mrf.mxu1 }
 0x48d   : > { %1423 = vst [vmem:[#allocation4 + $0xc] sm:$0xf] %v1422_v6 }
 0x494   : > { %v3643_v52 = vld [vmem:[#allocation4 + $0x8] sm:$0xff]  }
 0x495   : > { %1699 = vmatmul.mubr.bf16.gmra.mxu0 %v3643_v52  ;;  %1752 = vmatmul.mubr.bf16.gmra.mxu1 %v3643_v52 }
 0x496   : > { %1994 = vmatprep.mubr.bf16.mxu0 %v4867_v60  ;;  %3299 = vmatprep.mubr.msk.bf16.mxu1 %vm3927_vm1, %v4866_v43 }
 0x49d   : > { %1995 = vmatmul.mubr.bf16.vlgmr.msra.gmra.mxu0 %v1830_v62  ;;  %3300 = vmatmul.mubr.bf16.vlgmr.msra.gmra.mxu1 %v1830_v62 }
 0x49e   : > { %3304 = vmatpush3.bf16.msra.mxu0 %v4529_v46  ;;  %3319 = vmatprep.mubr.msk.bf16.mxu0 %vm3927_vm1, %v4866_v43 }
 0x49f   : > { %3305 = vmatprep.subr.bf16.mxu0 %v4866_v43  ;;  %2165 = vmatpush1.bf16.msra.mxu1 %v4442_v21 }
 0x4a0   : > { %2166 = vmatprep.subr.bf16.mxu1 %v4449_v23  ;;  %2196 = vmatprep.mubr.bf16.mxu1 %v4867_v60 }
 0x4a2   : > { %3306 = vmatpush3.bf16.msra.mxu0 %v4532_v11 }
 0x4a3   : > { %3307 = vmatprep.subr.bf16.mxu0 %v4866_v43  ;;  %2167 = vmatpush1.bf16.msra.mxu1 %v4451_v24 }
 0x4a4   : > { %2168 = vmatprep.subr.bf16.mxu1 %v4459_v26 }
 0x4a6   : > { %3308 = vmatpush3.bf16.msra.mxu0 %v4541_v50 }
 0x4a7   : > { %3309 = vmatprep.subr.bf16.mxu0 %v4866_v43  ;;  %2169 = vmatpush1.bf16.msra.mxu1 %v4461_v27 }
 0x4a8   : > { %2170 = vmatprep.subr.bf16.mxu1 %v4469_v29 }
 0x4aa   : > { %3310 = vmatpush3.bf16.msra.mxu0 %v4547_v56 }
 0x4ab   : > { %3311 = vmatprep.subr.bf16.mxu0 %v4866_v43  ;;  %2171 = vmatpush1.bf16.msra.mxu1 %v4471_v30 }
 0x4ac   : > { %2172 = vmatprep.subr.bf16.mxu1 %v4479_v33 }
 0x4ae   : > { %3312 = vmatpush3.bf16.msra.mxu0 %v4553_v59 }
 0x4af   : > { %3313 = vmatprep.subr.bf16.mxu0 %v4866_v43  ;;  %2173 = vmatpush1.bf16.msra.mxu1 %v4481_v4 }
 0x4b0   : > { %2174 = vmatprep.subr.bf16.mxu1 %v4487_v53 }
 0x4b2   : > { %3314 = vmatpush3.bf16.msra.mxu0 %v4559_v35 }
 0x4b3   : > { %3315 = vmatprep.subr.bf16.mxu0 %v4866_v43  ;;  %2175 = vmatpush1.bf16.msra.mxu1 %v4490_v44 }
 0x4b4   : > { %2176 = vmatprep.subr.bf16.mxu1 %v4496_v19 }
 0x4b6   : > { %3316 = vmatpush3.bf16.msra.mxu0 %v4565_v61 }
 0x4b7   : > { %3317 = vmatprep.subr.bf16.mxu0 %v4866_v43  ;;  %2177 = vmatpush1.bf16.msra.mxu1 %v4502_v32 }
 0x4b8   : > { %2178 = vmatprep.subr.bf16.mxu1 %v4508_v55 }
 0x4ba   : > { %3318 = vmatpush3.bf16.msra.mxu0 %v4571_v34 }
 0x4bb   : > { %3323 = vmatprep.subr.bf16.mxu0 %v4866_v43  ;;  %2179 = vmatpush1.bf16.msra.mxu1 %v4510_v5 }
 0x4bc   : > { %3343 = vmatprep.subr.bf16.mxu1 %v4866_v43 }
 0x4bd   : > { %3320 = vmatmul.mubr.bf16.vlgmr.msra.gmra.mxu0 %v1830_v62 }
 0x4be   : > { %3324 = vmatpush3.bf16.msra.mxu0 %v4445_v22  ;;  %3339 = vmatprep.mubr.msk.bf16.mxu0 %vm3927_vm1, %v4866_v43 }
 0x4bf   : > { %3325 = vmatprep.subr.bf16.mxu0 %v4866_v43 }
 0x4c2   : > { %3326 = vmatpush3.bf16.msra.mxu0 %v4455_v25 }
 0x4c3   : > { %3327 = vmatprep.subr.bf16.mxu0 %v4866_v43 }
 0x4c6   : > { %3328 = vmatpush3.bf16.msra.mxu0 %v4465_v28 }
 0x4c7   : > { %3329 = vmatprep.subr.bf16.mxu0 %v4866_v43 }
 0x4ca   : > { %3330 = vmatpush3.bf16.msra.mxu0 %v4475_v31 }
 0x4cb   : > { %3331 = vmatprep.subr.bf16.mxu0 %v4866_v43 }
 0x4ce   : > { %3332 = vmatpush3.bf16.msra.mxu0 %v4485_v54 }
 0x4cf   : > { %3333 = vmatprep.subr.bf16.mxu0 %v4866_v43 }
 0x4d2   : > { %3334 = vmatpush3.bf16.msra.mxu0 %v4494_v57 }
 0x4d3   : > { %3335 = vmatprep.subr.bf16.mxu0 %v4866_v43 }
 0x4d6   : > { %3336 = vmatpush3.bf16.msra.mxu0 %v4505_v47 }
 0x4d7   : > { %3337 = vmatprep.subr.bf16.mxu0 %v4866_v43 }
 0x4da   : > { %3338 = vmatpush3.bf16.msra.mxu0 %v4513_v58 }
 0x4db   : > { %2318 = vmatprep.subr.bf16.mxu0 %v4440_v20 }
 0x555   : > { %v4606_v39 = vpop.f32.mrf.mxu0  ;;  %v4608_v3 = vpop.f32.mrf.mxu1 }
 0x556   : > { %4874 = vst [vmem:[#allocation18_spill] sm:$0xff] %v4606_v39  ;;  %4875 = vst [vmem:[#allocation17_spill] sm:$0xff] %v4608_v3 }
 0x557   : > { %v4613_v0 = vpop.f32.mrf.mxu0  ;;  %v4615_v40 = vpop.f32.mrf.mxu1 }
 0x558   : > { %4876 = vst [vmem:[#allocation19_spill] sm:$0xff] %v4613_v0  ;;  %4877 = vst [vmem:[#allocation20_spill] sm:$0xff] %v4615_v40 }
 0x559   : > { %v4621_v9 = vpop.f32.mrf.mxu0  ;;  %v4623_v42 = vpop.f32.mrf.mxu1 }
 0x55a   : > { %4880 = vst [vmem:[#allocation21_spill] sm:$0xff] %v4621_v9  ;;  %4881 = vst [vmem:[#allocation22_spill] sm:$0xff] %v4623_v42 }
 0x55b   : > { %v4629_v13 = vpop.f32.mrf.mxu0  ;;  %v4631_v14 = vpop.f32.mrf.mxu1 }
 0x55c   : > { %4883 = vst [vmem:[#allocation16_spill] sm:$0xff] %v4629_v13  ;;  %4884 = vst [vmem:[#allocation23_spill] sm:$0xff] %v4631_v14  ;;  %v4885_v14 = vsub.s32 2, %v4878_v45 }
 0x55d   : > { %v1996_v16 = vpop.f32.mrf.mxu0  ;;  %v2037_v17 = vpop.f32.mrf.mxu1 }
 0x55e   : > { %v2043_v6 = vadd.f32 %v1996_v16, %v1691_v15  ;;  %v4637_v63 = vrot.slane %v1462_v1, %v4885_v14  ;;  %v4886_v16 = vsub.s32 3, %v4878_v45 }
 0x55f   : > { %v1998_v52 = vpop.f32.mrf.mxu0  ;;  %v3301_v7 = vpop.f32.mrf.mxu1 }
 0x560   : > { %v2044_v62 = vadd.f32 %v1998_v52, %v1693_v18  ;;  %v2946_v40 = vmul.f32 -1.442695, %v2043_v6  ;;  %v1744_v36 = vadd.f32 %v1743_v2, %v4637_v63  ;;  %v4642_v18 = vrot.slane %v1462_v1, %v4886_v16  ;;  %v1829_v2 = vld [vmem:[#allocation3] sm:$0xff] }
 0x561   : > { %v2000_v41 = vpop.f32.mrf.mxu0  ;;  %v2040_v42 = vpop.f32.mrf.mxu1  ;;  %v1695_v16 = vadd.f32 %v4598_v37, %v4619_v8 }
 0x562   : > { %v2947_v9 = vmul.f32 -1.442695, %v2044_v62  ;;  %v2045_v42 = vadd.f32 %v2037_v17, %v1744_v36 }
 0x563   : > { %v2001_v10 = vpop.f32.mrf.mxu0  ;;  %v3302_v3 = vpop.f32.mrf.mxu1 }
 0x564   : > { %3722 = vpow2.f32 %v2947_v9  ;;  %v1746_v3 = vadd.f32 %v1745_v48, %v4642_v18 }
 0x565   : > { %3724 = vpow2.f32 %v2946_v40 }
 0x571   : > { %v3723_v13 = vpop.eup %3722 }
 0x572   : > { %v3725_v0 = vpop.eup %3724  ;;  %v2145_v39 = vadd.f32 1.0, %v3723_v13 }
 0x573   : > { %v2139_v15 = vadd.f32 1.0, %v3725_v0 }
 0x574   : > { %3726 = vrcp.f32 %v2145_v39 }
 0x575   : > { %3728 = vrcp.f32 %v2139_v15 }
 0x576   : > { %3730 = vtanh.f32 %v2045_v42 }
 0x57d   : > { %v2129_v40 = vpop.f32.mrf.mxu0 }
 0x57e   : > { %v2135_v9 = vadd.f32 %v2129_v40, %v1746_v3  ;;  %v1697_v40 = vadd.f32 %v4602_v38, %v4627_v12 }
 0x57f   : > { %v3321_v6 = vpop.f32.mrf.mxu0 }
 0x580   : > { %v2948_v14 = vmul.f32 -1.442695, %v2135_v9 }
 0x581   : > { %v2132_v52 = vpop.f32.mrf.mxu0  ;;  %v3727_v7 = vpop.eup %3726 }
 0x582   : > { %3732 = vpow2.f32 %v2948_v14  ;;  %v3729_v0 = vpop.eup %3728  ;;  %v2149_v62 = vmul.f32 %v3727_v7, %v1829_v2 }
 0x583   : > { %v3322_v13 = vpop.f32.mrf.mxu0  ;;  %v3731_v45 = vpop.eup %3730 }
 0x584   : > { %v2150_v1 = vmul.f32 %v3731_v45, %v3729_v0 }
 0x586   : > { %v4645_v41 = vadd.f32 %v2150_v1, %v2149_v62 }
 0x588   : > { %3734 = vtanh.f32 %v4645_v41 }
 0x58f   : > { %v3733_v39 = vpop.eup %3732 }
 0x590   : > { %v2155_v17 = vadd.f32 1.0, %v3733_v39 }
 0x592   : > { %3736 = vrcp.f32 %v2155_v17 }
 0x595   : > { %v3735_v48 = vpop.eup %3734 }
 0x59f   : > { %v3737_v10 = vpop.eup %3736 }
 0x5a0   : > { %v2159_v36 = vmul.f32 %v3737_v10, %v3735_v48  ;;  %v1750_v48 = vadd.f32 %v4604_v49, %v4642_v18 }
 0x5a2   : > { %v2160_v15 = vpack.c.bf16 %v2159_v36, %v2159_v36 }
 0x5a4   : > { %2197 = vmatmul.mubr.bf16.vlgmr.msra.gmra.mxu1 %v2160_v15  ;;  %3340 = vmatmul.mubr.bf16.vlgmr.msra.gmra.mxu0 %v2160_v15 }
 0x5a5   : > { %3344 = vmatpush3.bf16.msra.mxu1 %v4529_v46  ;;  %3359 = vmatprep.mubr.msk.bf16.mxu1 %vm3927_vm1, %v4866_v43 }
 0x5a6   : > { %3345 = vmatprep.subr.bf16.mxu1 %v4866_v43  ;;  %2319 = vmatpush1.bf16.msra.mxu0 %v4442_v21 }
 0x5a7   : > { %2320 = vmatprep.subr.bf16.mxu0 %v4449_v23  ;;  %2350 = vmatprep.mubr.bf16.mxu0 %v4867_v60 }
 0x5a9   : > { %3346 = vmatpush3.bf16.msra.mxu1 %v4532_v11 }
 0x5aa   : > { %3347 = vmatprep.subr.bf16.mxu1 %v4866_v43  ;;  %2321 = vmatpush1.bf16.msra.mxu0 %v4451_v24 }
 0x5ab   : > { %2322 = vmatprep.subr.bf16.mxu0 %v4459_v26 }
 0x5ad   : > { %3348 = vmatpush3.bf16.msra.mxu1 %v4541_v50 }
 0x5ae   : > { %3349 = vmatprep.subr.bf16.mxu1 %v4866_v43  ;;  %2323 = vmatpush1.bf16.msra.mxu0 %v4461_v27 }
 0x5af   : > { %2324 = vmatprep.subr.bf16.mxu0 %v4469_v29 }
 0x5b1   : > { %3350 = vmatpush3.bf16.msra.mxu1 %v4547_v56 }
 0x5b2   : > { %3351 = vmatprep.subr.bf16.mxu1 %v4866_v43  ;;  %2325 = vmatpush1.bf16.msra.mxu0 %v4471_v30 }
 0x5b3   : > { %2326 = vmatprep.subr.bf16.mxu0 %v4479_v33 }
 0x5b5   : > { %3352 = vmatpush3.bf16.msra.mxu1 %v4553_v59 }
 0x5b6   : > { %3353 = vmatprep.subr.bf16.mxu1 %v4866_v43  ;;  %2327 = vmatpush1.bf16.msra.mxu0 %v4481_v4 }
 0x5b7   : > { %2328 = vmatprep.subr.bf16.mxu0 %v4487_v53 }
 0x5b9   : > { %3354 = vmatpush3.bf16.msra.mxu1 %v4559_v35 }
 0x5ba   : > { %3355 = vmatprep.subr.bf16.mxu1 %v4866_v43  ;;  %2329 = vmatpush1.bf16.msra.mxu0 %v4490_v44 }
 0x5bb   : > { %2330 = vmatprep.subr.bf16.mxu0 %v4496_v19 }
 0x5bd   : > { %3356 = vmatpush3.bf16.msra.mxu1 %v4565_v61 }
 0x5be   : > { %3357 = vmatprep.subr.bf16.mxu1 %v4866_v43  ;;  %2331 = vmatpush1.bf16.msra.mxu0 %v4502_v32 }
 0x5bf   : > { %2332 = vmatprep.subr.bf16.mxu0 %v4508_v55 }
 0x5c1   : > { %3358 = vmatpush3.bf16.msra.mxu1 %v4571_v34 }
 0x5c2   : > { %3363 = vmatprep.subr.bf16.mxu1 %v4866_v43  ;;  %2333 = vmatpush1.bf16.msra.mxu0 %v4510_v5 }
 0x5c3   : > { %3383 = vmatprep.subr.bf16.mxu0 %v4866_v43 }
 0x5c4   : > { %3360 = vmatmul.mubr.bf16.vlgmr.msra.gmra.mxu1 %v2160_v15 }
 0x5c5   : > { %3364 = vmatpush3.bf16.msra.mxu1 %v4445_v22  ;;  %3379 = vmatprep.mubr.msk.bf16.mxu1 %vm3927_vm1, %v4866_v43 }
 0x5c6   : > { %3365 = vmatprep.subr.bf16.mxu1 %v4866_v43 }
 0x5c9   : > { %3366 = vmatpush3.bf16.msra.mxu1 %v4455_v25 }
 0x5ca   : > { %3367 = vmatprep.subr.bf16.mxu1 %v4866_v43 }
 0x5cd   : > { %3368 = vmatpush3.bf16.msra.mxu1 %v4465_v28 }
 0x5ce   : > { %3369 = vmatprep.subr.bf16.mxu1 %v4866_v43 }
 0x5d1   : > { %3370 = vmatpush3.bf16.msra.mxu1 %v4475_v31 }
 0x5d2   : > { %3371 = vmatprep.subr.bf16.mxu1 %v4866_v43 }
 0x5d5   : > { %3372 = vmatpush3.bf16.msra.mxu1 %v4485_v54 }
 0x5d6   : > { %3373 = vmatprep.subr.bf16.mxu1 %v4866_v43 }
 0x5d9   : > { %3374 = vmatpush3.bf16.msra.mxu1 %v4494_v57 }
 0x5da   : > { %3375 = vmatprep.subr.bf16.mxu1 %v4866_v43 }
 0x5dd   : > { %3376 = vmatpush3.bf16.msra.mxu1 %v4505_v47 }
 0x5de   : > { %3377 = vmatprep.subr.bf16.mxu1 %v4866_v43 }
 0x5e1   : > { %3378 = vmatpush3.bf16.msra.mxu1 %v4513_v58 }
 0x5e2   : > { %2472 = vmatprep.subr.bf16.mxu1 %v4440_v20  ;;  %v1748_v20 = vadd.f32 %v4600_v51, %v4637_v63 }
 0x664   : > { %v2198_v42 = vpop.f32.mrf.mxu1  ;;  %v2239_v3 = vpop.f32.mrf.mxu0 }
 0x665   : > { %v2245_v9 = vadd.f32 %v2198_v42, %v1695_v16  ;;  %v2247_v37 = vadd.f32 %v2239_v3, %v1748_v20 }
 0x666   : > { %v2200_v6 = vpop.f32.mrf.mxu1  ;;  %v3341_v14 = vpop.f32.mrf.mxu0 }
 0x667   : > { %v2949_v52 = vmul.f32 -1.442695, %v2245_v9  ;;  %v2246_v13 = vadd.f32 %v2200_v6, %v1697_v40 }
 0x668   : > { %v2202_v7 = vpop.f32.mrf.mxu1  ;;  %v2242_v2 = vpop.f32.mrf.mxu0 }
 0x669   : > { %3738 = vpow2.f32 %v2949_v52  ;;  %v2950_v0 = vmul.f32 -1.442695, %v2246_v13 }
 0x66a   : > { %v2203_v62 = vpop.f32.mrf.mxu1  ;;  %v3342_v45 = vpop.f32.mrf.mxu0 }
 0x66b   : > { %3740 = vpow2.f32 %v2950_v0 }
 0x66c   : > { %3742 = vtanh.f32 %v2247_v37 }
 0x676   : > { %v3739_v1 = vpop.eup %3738 }
 0x677   : > { %v2293_v39 = vadd.f32 1.0, %v3739_v1 }
 0x678   : > { %v3741_v38 = vpop.eup %3740 }
 0x679   : > { %3744 = vrcp.f32 %v2293_v39  ;;  %v2299_v17 = vadd.f32 1.0, %v3741_v38  ;;  %v3743_v36 = vpop.eup %3742 }
 0x67b   : > { %3746 = vrcp.f32 %v2299_v17 }
 0x684   : > { %v2283_v10 = vpop.f32.mrf.mxu1 }
 0x685   : > { %v2289_v15 = vadd.f32 %v2283_v10, %v1750_v48 }
 0x686   : > { %v3745_v16 = vpop.eup %3744  ;;  %v3361_v42 = vpop.f32.mrf.mxu1 }
 0x687   : > { %v2304_v40 = vmul.f32 %v3745_v16, %v3743_v36  ;;  %v2951_v9 = vmul.f32 -1.442695, %v2289_v15 }
 0x688   : > { %v2286_v6 = vpop.f32.mrf.mxu1  ;;  %v3747_v3 = vpop.eup %3746 }
 0x689   : > { %3748 = vpow2.f32 %v2951_v9  ;;  %v2303_v14 = vmul.f32 %v3747_v3, %v4645_v41 }
 0x68a   : > { %v3362_v51 = vpop.f32.mrf.mxu1 }
 0x68b   : > { %v4710_v52 = vadd.f32 %v2304_v40, %v2303_v14 }
 0x68d   : > { %3750 = vtanh.f32 %v4710_v52 }
 0x696   : > { %v3749_v13 = vpop.eup %3748 }
 0x697   : > { %v2309_v7 = vadd.f32 1.0, %v3749_v13 }
 0x699   : > { %3752 = vrcp.f32 %v2309_v7 }
 0x69a   : > { %v3751_v49 = vpop.eup %3750 }
 0x6a6   : > { %v3753_v2 = vpop.eup %3752 }
 0x6a7   : > { %v2313_v0 = vmul.f32 %v3753_v2, %v3751_v49 }
 0x6a9   : > { %v2314_v62 = vpack.c.bf16 %v2313_v0, %v2313_v0 }
 0x6ab   : > { %2351 = vmatmul.mubr.bf16.vlgmr.msra.gmra.mxu0 %v2314_v62  ;;  %3380 = vmatmul.mubr.bf16.vlgmr.msra.gmra.mxu1 %v2314_v62 }
 0x6ac   : > { %3384 = vmatpush3.bf16.msra.mxu0 %v4529_v46  ;;  %3399 = vmatprep.mubr.msk.bf16.mxu0 %vm3927_vm1, %v4866_v43 }
 0x6ad   : > { %3385 = vmatprep.subr.bf16.mxu0 %v4866_v43  ;;  %2473 = vmatpush1.bf16.msra.mxu1 %v4442_v21 }
 0x6ae   : > { %2474 = vmatprep.subr.bf16.mxu1 %v4449_v23  ;;  %2504 = vmatprep.mubr.bf16.mxu1 %v4867_v60  ;;  %v4887_v60 = vld [vmem:[#allocation18_spill] sm:$0xff] }
 0x6af   : > { %v1701_v21 = vadd.f32 %v4887_v60, %v4619_v8 }
 0x6b0   : > { %3386 = vmatpush3.bf16.msra.mxu0 %v4532_v11 }
 0x6b1   : > { %3387 = vmatprep.subr.bf16.mxu0 %v4866_v43  ;;  %2475 = vmatpush1.bf16.msra.mxu1 %v4451_v24  ;;  %v4888_v24 = vld [vmem:[#allocation19_spill] sm:$0xff] }
 0x6b2   : > { %2476 = vmatprep.subr.bf16.mxu1 %v4459_v26 }
 0x6b4   : > { %3388 = vmatpush3.bf16.msra.mxu0 %v4541_v50 }
 0x6b5   : > { %3389 = vmatprep.subr.bf16.mxu0 %v4866_v43  ;;  %2477 = vmatpush1.bf16.msra.mxu1 %v4461_v27 }
 0x6b6   : > { %2478 = vmatprep.subr.bf16.mxu1 %v4469_v29 }
 0x6b8   : > { %3390 = vmatpush3.bf16.msra.mxu0 %v4547_v56 }
 0x6b9   : > { %3391 = vmatprep.subr.bf16.mxu0 %v4866_v43  ;;  %2479 = vmatpush1.bf16.msra.mxu1 %v4471_v30 }
 0x6ba   : > { %2480 = vmatprep.subr.bf16.mxu1 %v4479_v33 }
 0x6bc   : > { %3392 = vmatpush3.bf16.msra.mxu0 %v4553_v59 }
 0x6bd   : > { %3393 = vmatprep.subr.bf16.mxu0 %v4866_v43  ;;  %2481 = vmatpush1.bf16.msra.mxu1 %v4481_v4 }
 0x6be   : > { %2482 = vmatprep.subr.bf16.mxu1 %v4487_v53 }
 0x6c0   : > { %3394 = vmatpush3.bf16.msra.mxu0 %v4559_v35 }
 0x6c1   : > { %3395 = vmatprep.subr.bf16.mxu0 %v4866_v43  ;;  %2483 = vmatpush1.bf16.msra.mxu1 %v4490_v44  ;;  %v4889_v44 = vld [vmem:[#allocation17_spill] sm:$0xff] }
 0x6c2   : > { %2484 = vmatprep.subr.bf16.mxu1 %v4496_v19 }
 0x6c4   : > { %3396 = vmatpush3.bf16.msra.mxu0 %v4565_v61 }
 0x6c5   : > { %3397 = vmatprep.subr.bf16.mxu0 %v4866_v43  ;;  %2485 = vmatpush1.bf16.msra.mxu1 %v4502_v32 }
 0x6c6   : > { %2486 = vmatprep.subr.bf16.mxu1 %v4508_v55 }
 0x6c8   : > { %3398 = vmatpush3.bf16.msra.mxu0 %v4571_v34 }
 0x6c9   : > { %3403 = vmatprep.subr.bf16.mxu0 %v4866_v43  ;;  %2487 = vmatpush1.bf16.msra.mxu1 %v4510_v5 }
 0x6ca   : > { %3423 = vmatprep.subr.bf16.mxu1 %v4866_v43 }
 0x6cb   : > { %3400 = vmatmul.mubr.bf16.vlgmr.msra.gmra.mxu0 %v2314_v62  ;;  %v4893_v62 = vld [vmem:[#allocation22_spill] sm:$0xff] }
 0x6cc   : > { %3404 = vmatpush3.bf16.msra.mxu0 %v4445_v22  ;;  %3419 = vmatprep.mubr.msk.bf16.mxu0 %vm3927_vm1, %v4866_v43 }
 0x6cd   : > { %3405 = vmatprep.subr.bf16.mxu0 %v4866_v43 }
 0x6d0   : > { %3406 = vmatpush3.bf16.msra.mxu0 %v4455_v25  ;;  %v1703_v25 = vadd.f32 %v4888_v24, %v4627_v12  ;;  %v4894_v24 = vld [vmem:[#allocation23_spill] sm:$0xff] }
 0x6d1   : > { %3407 = vmatprep.subr.bf16.mxu0 %v4866_v43 }
 0x6d4   : > { %3408 = vmatpush3.bf16.msra.mxu0 %v4465_v28 }
 0x6d5   : > { %3409 = vmatprep.subr.bf16.mxu0 %v4866_v43 }
 0x6d8   : > { %3410 = vmatpush3.bf16.msra.mxu0 %v4475_v31 }
 0x6d9   : > { %3411 = vmatprep.subr.bf16.mxu0 %v4866_v43 }
 0x6dc   : > { %3412 = vmatpush3.bf16.msra.mxu0 %v4485_v54 }
 0x6dd   : > { %3413 = vmatprep.subr.bf16.mxu0 %v4866_v43 }
 0x6e0   : > { %3414 = vmatpush3.bf16.msra.mxu0 %v4494_v57  ;;  %v1754_v57 = vadd.f32 %v4889_v44, %v4637_v63 }
 0x6e1   : > { %3415 = vmatprep.subr.bf16.mxu0 %v4866_v43 }
 0x6e4   : > { %3416 = vmatpush3.bf16.msra.mxu0 %v4505_v47 }
 0x6e5   : > { %3417 = vmatprep.subr.bf16.mxu0 %v4866_v43 }
 0x6e8   : > { %3418 = vmatpush3.bf16.msra.mxu0 %v4513_v58  ;;  %v4890_v58 = vld [vmem:[#allocation20_spill] sm:$0xff] }
 0x6e9   : > { %v1756_v41 = vadd.f32 %v4890_v58, %v4642_v18 }
 0x76b   : > { %v2352_v22 = vpop.f32.mrf.mxu0  ;;  %v2393_v23 = vpop.f32.mrf.mxu1 }
 0x76c   : > { %v2399_v26 = vadd.f32 %v2352_v22, %v1701_v21  ;;  %v2401_v19 = vadd.f32 %v2393_v23, %v1754_v57 }
 0x76d   : > { %v2354_v27 = vpop.f32.mrf.mxu0  ;;  %v3381_v28 = vpop.f32.mrf.mxu1 }
 0x76e   : > { %v2952_v29 = vmul.f32 -1.442695, %v2399_v26  ;;  %v2400_v30 = vadd.f32 %v2354_v27, %v1703_v25  ;;  %v1760_v25 = vadd.f32 %v4894_v24, %v4642_v18 }
 0x76f   : > { %v2356_v31 = vpop.f32.mrf.mxu0  ;;  %v2396_v33 = vpop.f32.mrf.mxu1 }
 0x770   : > { %3754 = vpow2.f32 %v2952_v29  ;;  %v2953_v4 = vmul.f32 -1.442695, %v2400_v30 }
 0x771   : > { %v2357_v54 = vpop.f32.mrf.mxu0  ;;  %v3382_v53 = vpop.f32.mrf.mxu1 }
 0x772   : > { %3756 = vpow2.f32 %v2953_v4 }
 0x773   : > { %3758 = vtanh.f32 %v2401_v19 }
 0x77d   : > { %v3755_v32 = vpop.eup %3754 }
 0x77e   : > { %v2447_v47 = vadd.f32 1.0, %v3755_v32 }
 0x77f   : > { %v3757_v55 = vpop.eup %3756 }
 0x780   : > { %3760 = vrcp.f32 %v2447_v47  ;;  %v2453_v5 = vadd.f32 1.0, %v3757_v55  ;;  %v3759_v20 = vpop.eup %3758 }
 0x782   : > { %3762 = vrcp.f32 %v2453_v5 }
 0x78b   : > { %v2437_v45 = vpop.f32.mrf.mxu0 }
 0x78c   : > { %v2443_v37 = vadd.f32 %v2437_v45, %v1756_v41 }
 0x78d   : > { %v3761_v1 = vpop.eup %3760  ;;  %v3401_v39 = vpop.f32.mrf.mxu0 }
 0x78e   : > { %v2458_v38 = vmul.f32 %v3761_v1, %v3759_v20  ;;  %v2954_v17 = vmul.f32 -1.442695, %v2443_v37 }
 0x78f   : > { %v3763_v48 = vpop.eup %3762  ;;  %v2440_v10 = vpop.f32.mrf.mxu0 }
 0x790   : > { %v2457_v36 = vmul.f32 %v3763_v48, %v4710_v52  ;;  %3764 = vpow2.f32 %v2954_v17 }
 0x791   : > { %v3402_v15 = vpop.f32.mrf.mxu0 }
 0x792   : > { %v4774_v16 = vadd.f32 %v2458_v38, %v2457_v36 }
 0x794   : > { %3766 = vtanh.f32 %v4774_v16 }
 0x79d   : > { %v3765_v42 = vpop.eup %3764 }
 0x79e   : > { %v2463_v40 = vadd.f32 1.0, %v3765_v42 }
 0x7a0   : > { %3768 = vrcp.f32 %v2463_v40 }
 0x7a1   : > { %v3767_v9 = vpop.eup %3766 }
 0x7ad   : > { %v3769_v6 = vpop.eup %3768 }
 0x7ae   : > { %v2467_v51 = vmul.f32 %v3769_v6, %v3767_v9 }
 0x7b0   : > { %v2468_v3 = vpack.c.bf16 %v2467_v51, %v2467_v51 }
 0x7b2   : > { %2505 = vmatmul.mubr.bf16.vlgmr.msra.gmra.mxu1 %v2468_v3  ;;  %3420 = vmatmul.mubr.bf16.vlgmr.msra.gmra.mxu0 %v2468_v3 }
 0x7b3   : > { %3424 = vmatpush3.bf16.msra.mxu1 %v4529_v46  ;;  %3439 = vmatprep.mubr.msk.bf16.mxu1 %vm3927_vm1, %v4866_v43  ;;  %v4891_v46 = vld [vmem:[#allocation21_spill] sm:$0xff] }
 0x7b4   : > { %3425 = vmatprep.subr.bf16.mxu1 %v4866_v43 }
 0x7b7   : > { %3426 = vmatpush3.bf16.msra.mxu1 %v4532_v11  ;;  %v1705_v11 = vadd.f32 %v4891_v46, %v4619_v8  ;;  %v1758_v8 = vadd.f32 %v4893_v62, %v4637_v63 }
 0x7b8   : > { %3427 = vmatprep.subr.bf16.mxu1 %v4866_v43 }
 0x7bb   : > { %3428 = vmatpush3.bf16.msra.mxu1 %v4541_v50 }
 0x7bc   : > { %3429 = vmatprep.subr.bf16.mxu1 %v4866_v43 }
 0x7bf   : > { %3430 = vmatpush3.bf16.msra.mxu1 %v4547_v56 }
 0x7c0   : > { %3431 = vmatprep.subr.bf16.mxu1 %v4866_v43 }
 0x7c3   : > { %3432 = vmatpush3.bf16.msra.mxu1 %v4553_v59  ;;  %v4892_v59 = vld [vmem:[#allocation16_spill] sm:$0xff] }
 0x7c4   : > { %3433 = vmatprep.subr.bf16.mxu1 %v4866_v43  ;;  %v1707_v14 = vadd.f32 %v4892_v59, %v4627_v12 }
 0x7c7   : > { %3434 = vmatpush3.bf16.msra.mxu1 %v4559_v35 }
 0x7c8   : > { %3435 = vmatprep.subr.bf16.mxu1 %v4866_v43 }
 0x7cb   : > { %3436 = vmatpush3.bf16.msra.mxu1 %v4565_v61 }
 0x7cc   : > { %3437 = vmatprep.subr.bf16.mxu1 %v4866_v43 }
 0x7cf   : > { %3438 = vmatpush3.bf16.msra.mxu1 %v4571_v34 }
 0x7d2   : > { %3440 = vmatmul.mubr.bf16.vlgmr.msra.gmra.mxu1 %v2468_v3 }
 0x872   : > { %v2506_v50 = vpop.f32.mrf.mxu1  ;;  %v2547_v56 = vpop.f32.mrf.mxu0 }
 0x873   : > { %v2553_v52 = vadd.f32 %v2506_v50, %v1705_v11  ;;  %v2555_v60 = vadd.f32 %v2547_v56, %v1758_v8 }
 0x874   : > { %v2508_v13 = vpop.f32.mrf.mxu1  ;;  %v3421_v35 = vpop.f32.mrf.mxu0 }
 0x875   : > { %v2955_v7 = vmul.f32 -1.442695, %v2553_v52  ;;  %v2554_v49 = vadd.f32 %v2508_v13, %v1707_v14 }
 0x876   : > { %v2510_v2 = vpop.f32.mrf.mxu1  ;;  %v2550_v61 = vpop.f32.mrf.mxu0 }
 0x877   : > { %3770 = vpow2.f32 %v2955_v7  ;;  %v2956_v43 = vmul.f32 -1.442695, %v2554_v49 }
 0x878   : > { %v2511_v0 = vpop.f32.mrf.mxu1  ;;  %v3422_v34 = vpop.f32.mrf.mxu0 }
 0x879   : > { %3772 = vpow2.f32 %v2956_v43 }
 0x87a   : > { %3774 = vtanh.f32 %v2555_v60 }
 0x884   : > { %v3771_v21 = vpop.eup %3770 }
 0x885   : > { %v2601_v22 = vadd.f32 1.0, %v3771_v21 }
 0x886   : > { %v3773_v23 = vpop.eup %3772 }
 0x887   : > { %3776 = vrcp.f32 %v2601_v22  ;;  %v2607_v12 = vadd.f32 1.0, %v3773_v23  ;;  %v3775_v27 = vpop.eup %3774 }
 0x889   : > { %3778 = vrcp.f32 %v2607_v12 }
 0x892   : > { %v2591_v26 = vpop.f32.mrf.mxu1 }
 0x893   : > { %v2597_v28 = vadd.f32 %v2591_v26, %v1760_v25 }
 0x894   : > { %v3777_v29 = vpop.eup %3776  ;;  %v3441_v30 = vpop.f32.mrf.mxu1 }
 0x895   : > { %v2612_v31 = vmul.f32 %v3777_v29, %v3775_v27  ;;  %v2957_v33 = vmul.f32 -1.442695, %v2597_v28 }
 0x896   : > { %v3779_v4 = vpop.eup %3778  ;;  %v2594_v63 = vpop.f32.mrf.mxu1 }
 0x897   : > { %v2611_v54 = vmul.f32 %v3779_v4, %v4774_v16  ;;  %3780 = vpow2.f32 %v2957_v33 }
 0x898   : > { %v3442_v53 = vpop.f32.mrf.mxu1 }
 0x899   : > { %v2613_v44 = vadd.f32 %v2612_v31, %v2611_v54 }
 0x89b   : > { %2623 = vst [vmem:[#allocation3] sm:$0xff] %v2613_v44  ;;  %3782 = vtanh.f32 %v2613_v44 }
 0x8a4   : > { %v3781_v57 = vpop.eup %3780 }
 0x8a5   : > { %v2617_v19 = vadd.f32 1.0, %v3781_v57 }
 0x8a7   : > { %3784 = vrcp.f32 %v2617_v19 }
 0x8a8   : > { %v3783_v18 = vpop.eup %3782 }
 0x8b3   : > { %2627 = sbr.rel (%p2958_p2) target bundleno = 2464 (0x9a0), region = 80 }
 0x8b4   : > { %v3785_v32 = vpop.eup %3784 }
 0x8b5   : > { %v2621_v47 = vmul.f32 %v3785_v32, %v3783_v18 }
 0x8b7   : > { %2622 = vst [vmem:[#allocation2 + $0x8] sm:$0xff] %v2621_v47 }
 0x8b8   : > { %v3786_v55 = vld [vmem:[%s4844_s7 + $0x38] sm:$0xff]   ;;  %v3928_v5 = vmov 0.0   ;;  %v3787_v58 = vld [vmem:[%s4844_s7 + $0x30] sm:$0xff]   ;;  %vm3929_vm2 = vmmov 0   ;;  %v3788_v41 = vld [vmem:[%s4844_s7 + $0x28] sm:$0xff]   ;;  %v2628_v38 = vpack.c.bf16 %v2621_v47, %v2621_v47  ;;  %vm2740_vm3 = vcmask 64512  }
 0x8b9   : > { %3443 = vmatprep.subr.bf16.mxu0 %v3928_v5  ;;  %3459 = vmatprep.mubr.msk.bf16.mxu0 %vm3929_vm2, %v3928_v5  ;;  %v3789_v45 = vld [vmem:[%s4844_s7 + $0x20] sm:$0xff]   ;;  %v3790_v20 = vld [vmem:[%s4844_s7 + $0x18] sm:$0xff]   ;;  %v3791_v37 = vld [vmem:[%s4844_s7 + $0x10] sm:$0xff]  }
 0x8ba   : > { %3444 = vmatpush3.bf16.msra.mxu0 %v3786_v55  ;;  %v3792_v1 = vld [vmem:[%s4844_s7 + $0x8] sm:$0xff]   ;;  %v3793_v39 = vld [vmem:[%s4844_s7] sm:$0xff]  }
 0x8bb   : > { %3445 = vmatprep.subr.bf16.mxu0 %v3928_v5  ;;  %v2959_v17 = vld [vmem:[%s4845_s8] ss:$0 sm:$0xff] }
 0x8be   : > { %3446 = vmatpush3.bf16.msra.mxu0 %v3787_v58 }
 0x8bf   : > { %3447 = vmatprep.subr.bf16.mxu0 %v3928_v5 }
 0x8c2   : > { %3448 = vmatpush3.bf16.msra.mxu0 %v3788_v41 }
 0x8c3   : > { %3449 = vmatprep.subr.bf16.mxu0 %v3928_v5 }
 0x8c6   : > { %3450 = vmatpush3.bf16.msra.mxu0 %v3789_v45 }
 0x8c7   : > { %3451 = vmatprep.subr.bf16.mxu0 %v3928_v5 }
 0x8ca   : > { %3452 = vmatpush3.bf16.msra.mxu0 %v3790_v20 }
 0x8cb   : > { %3453 = vmatprep.subr.bf16.mxu0 %v3928_v5 }
 0x8ce   : > { %3454 = vmatpush3.bf16.msra.mxu0 %v3791_v37 }
 0x8cf   : > { %3455 = vmatprep.subr.bf16.mxu0 %v3928_v5 }
 0x8d2   : > { %3456 = vmatpush3.bf16.msra.mxu0 %v3792_v1 }
 0x8d3   : > { %3457 = vmatprep.subr.bf16.mxu0 %v3928_v5 }
 0x8d6   : > { %3458 = vmatpush3.bf16.msra.mxu0 %v3793_v39 }
 0x8d9   : > { %3460 = vmatmul.mubr.bf16.vlgmr.msra.gmra.mxu0 %v2628_v38 }
 0x999   : > { %v2734_v48 = vpop.f32.mrf.mxu0 }
 0x99a   : > { %v2735_v10 = vadd.f32 %v2959_v17, %v2734_v48 }
 0x99b   : > { %v3461_v36 = vpop.f32.mrf.mxu0 }
 0x99c   : > { %2741 = vst.msk [vmem:[%s4846_s9] sm:$0xff] %vm2740_vm3, %v2735_v10 }
 0x99d   : > { %v2737_v15 = vpop.f32.mrf.mxu0 }
 0x99f   : > { %v3462_v16 = vpop.f32.mrf.mxu0 }
 0x9a0 PF: > { %s22_s30 = sadd.s32 1, %s3916_s30  }
 0x9a1   : > { %p19_p3 = scmp.ge.s32.totalorder %s22_s30, 4  }
 0x9a3   :  { %21 = sbr.rel (!%p19_p3) target bundleno = 3 (0x3), region = 109 }
 0x9a8   :  { %2753 = vsyncpa [#allocation7], 1 }
 0x9a9   :  { %2755 = vsyncpa [#allocation7 + $0x1], 1 }
 0x9aa   :  { %2756 = vsyncpa [#allocation9], 1 }
 0x9ab   :  { %2757 = vsyncpa [#allocation12], 1 }

</bundles_post_ra>
